<compile_context>
chip_gen: v7x
topology: tpu7x:2x2x1
jax: 0.10.0
libtpu: 0.0.40
codegen_flags: <defaults>
</compile_context>

<pallas_src>
import functools

import jax
import jax.numpy as jnp
from jax import lax
from jax.experimental import pallas as pl
from jax.experimental.pallas import tpu as pltpu

_F32 = jnp.float32


# --------------------------------------------------------------------------
# VMEM sizing helpers.
# --------------------------------------------------------------------------
def _vmem_limit_bytes():
    """Scoped-VMEM limit sized off the real chip (v5e/v6e 128 MiB, v7x 64 MiB)."""
    phys = 64 * 1024 * 1024            # conservative default = v7x per-TC VMEM
    try:
        info = pltpu.get_tpu_info()
        phys = int(getattr(info, "vmem_capacity_bytes", phys))
    except Exception:
        pass
    limit = min(int(phys * 3 // 4), 100 * 1024 * 1024)
    return max(limit, 16 * 1024 * 1024)


def _tile_footprint_bytes(t, m, itemsize):
    # 2x double-buffered input block (native dtype) + f32 upcast + xn + exp
    # temporaries + the [t, t] diagonal window working set.
    return t * m * (2 * itemsize + 12) + 2 * t * t * 4


def _pick_row_tile(n_pad, m, itemsize, budget_bytes, max_rows=2048):
    best = 8
    t = 8
    cap = min(n_pad, max_rows)
    while t <= cap:
        if n_pad % t == 0 and _tile_footprint_bytes(t, m, itemsize) <= budget_bytes:
            best = t
        t += 8
    return best


# --------------------------------------------------------------------------
# Fused single-read kernel: whole forward in one block (fast path).
# --------------------------------------------------------------------------
def _fused_kernel(x_ref, out_ref, *, n_rows):
    npad, m = x_ref.shape
    x = x_ref[...].astype(_F32)                 # bf16 inputs upcast in VMEM

    rmask = None
    if npad != n_rows:                          # zero-padded rows
        rmask = lax.broadcasted_iota(jnp.int32, (npad, 1), 0) < n_rows

    count = n_rows * m
    mean = jnp.sum(x) / count                   # pad rows are exact zeros
    xc = x - mean
    xc_v = xc if rmask is None else jnp.where(rmask, xc, 0.0)
    var = jnp.sum(xc_v * xc_v) / (count - 1)    # torch.std: unbiased (ddof=1)
    inv_std = lax.rsqrt(jnp.maximum(var, 1e-12))
    xn = xc * inv_std

    # Ng = pos + neg = full row-sum of exp(xn) for the 'origin' masks.
    row_max = jnp.max(xn, axis=1, keepdims=True)
    ex = jnp.exp(xn - row_max)
    log_ng = row_max + jnp.log(jnp.sum(ex, axis=1, keepdims=True))

    # -log(pos) = -xn[r, r].
    rr = lax.broadcasted_iota(jnp.int32, (npad, 1), 0)
    cc = lax.broadcasted_iota(jnp.int32, (npad, m), 1)
    xn_diag = jnp.sum(jnp.where(cc == rr, xn, 0.0), axis=1, keepdims=True)

    terms = log_ng - xn_diag
    if rmask is not None:
        terms = jnp.where(rmask, terms, 0.0)
    out_ref[...] = (jnp.sum(terms) / n_rows) * jnp.ones((1, 1), _F32)


# --------------------------------------------------------------------------
# Pass 1 (tiled path): per-tile partial sum / sum-of-squares (parallel).
# --------------------------------------------------------------------------
def _partial_sums_kernel(x_ref, sum_ref, sumsq_ref):
    x = x_ref[...].astype(_F32)
    one = jnp.ones((1, 1, 1), _F32)
    sum_ref[...] = jnp.sum(x) * one
    sumsq_ref[...] = jnp.sum(x * x) * one


# --------------------------------------------------------------------------
# Pass 2 (tiled path): per-tile partial loss sum (parallel).
#   per-row term = log(sum_j exp(xn[r, j])) - xn[r, r]
# --------------------------------------------------------------------------
def _loss_partial_kernel(stats_ref, x_ref, out_ref, *, n_rows, n_pad,
                         use_diag_slice):
    mean = stats_ref[0]                          # SMEM scalars
    inv_std = stats_ref[1]
    i = pl.program_id(0)
    tr, m = x_ref.shape

    x = x_ref[...].astype(_F32)
    xn = (x - mean) * inv_std

    # Safe log-sum-exp over the full row (pos_mask + neg_mask == ones).
    row_max = jnp.max(xn, axis=1, keepdims=True)
    ex = jnp.exp(xn - row_max)
    log_ng = row_max + jnp.log(jnp.sum(ex, axis=1, keepdims=True))

    if use_diag_slice:
        # Diagonal positives live in the [tr, tr] column window starting at
        # global column i*tr; re-slice it from the VMEM-resident block -- no
        # full-width iota/where temporaries, work scales with tr not m.
        if n_pad <= m:
            hint = 128 if tr % 128 == 0 else 8
            start = pl.multiple_of(i * tr, hint)
            off = 0
        else:
            # Padded rows can push the window past m; clamp and shift the mask.
            start = jnp.minimum(i * tr, m - tr)
            off = i * tr - start
        blk = x_ref[:, pl.ds(start, tr)].astype(_F32)
        blk = (blk - mean) * inv_std
        lrow = lax.broadcasted_iota(jnp.int32, (tr, tr), 0)
        lcol = lax.broadcasted_iota(jnp.int32, (tr, tr), 1)
        xn_diag = jnp.sum(jnp.where(lcol == lrow + off, blk, 0.0),
                          axis=1, keepdims=True)
    else:
        # Fallback when the row tile is wider than M: full-width diagonal mask.
        grow = i * tr + lax.broadcasted_iota(jnp.int32, (tr, 1), 0)
        gcol = lax.broadcasted_iota(jnp.int32, (tr, m), 1)
        xn_diag = jnp.sum(jnp.where(gcol == grow, xn, 0.0),
                          axis=1, keepdims=True)

    terms = log_ng - xn_diag                                     # [tr, 1]
    if n_pad != n_rows:                                          # mask pad rows
        grow = i * tr + lax.broadcasted_iota(jnp.int32, (tr, 1), 0)
        terms = jnp.where(grow < n_rows, terms, 0.0)

    out_ref[...] = jnp.sum(terms) * jnp.ones((1, 1, 1), _F32)


# --------------------------------------------------------------------------
# Wrapper: full forward for method='origin'.
# --------------------------------------------------------------------------
def nce_softmax_loss_origin(x, *, tile_rows=None, force_two_pass=False):
    n, m = x.shape
    n_pad = -(-n // 8) * 8
    if n_pad != n:
        # Zero-pad the sublane dim; pad rows are masked inside the kernels
        # (and contribute exact zeros to the pass-1 sums).
        x = jnp.pad(x, ((0, n_pad - n), (0, 0)))

    itemsize = jnp.dtype(x.dtype).itemsize
    vmem_limit = _vmem_limit_bytes()
    budget = vmem_limit // 2            # headroom for compiler scratch/pipelining

    def _cparams(sem):
        return pltpu.CompilerParams(dimension_semantics=sem,
                                    vmem_limit_bytes=vmem_limit)

    # ---- single-read fused fast path: x is DMA'd from HBM exactly once. ----
    fused_bytes = n_pad * m * (2 * itemsize + 20)
    if (not force_two_pass) and tile_rows is None and fused_bytes <= budget:
        out = pl.pallas_call(
            functools.partial(_fused_kernel, n_rows=n),
            out_shape=jax.ShapeDtypeStruct((1, 1), _F32),
            grid=(1,),
            in_specs=[pl.BlockSpec((n_pad, m), lambda i: (0, 0))],
            out_specs=pl.BlockSpec((1, 1), lambda i: (0, 0)),
            compiler_params=_cparams(("arbitrary",)),
        )(x)
        return out[0, 0]

    # ---- two-pass tiled path (x read exactly twice). ------------------------
    tr = tile_rows if tile_rows is not None else _pick_row_tile(
        n_pad, m, itemsize, budget)
    assert n_pad % tr == 0, (n_pad, tr)
    grid_n = n_pad // tr

    # Pass 1: megacore-parallel partial sums; tree-reduce the tiny partials in
    # plain JAX (also numerically nicer than a serial scalar accumulator).
    sums, sumsqs = pl.pallas_call(
        _partial_sums_kernel,
        out_shape=(jax.ShapeDtypeStruct((grid_n, 1, 1), _F32),
                   jax.ShapeDtypeStruct((grid_n, 1, 1), _F32)),
        grid=(grid_n,),
        in_specs=[pl.BlockSpec((tr, m), lambda i: (i, 0))],
        out_specs=(pl.BlockSpec((1, 1, 1), lambda i: (i, 0, 0)),
                   pl.BlockSpec((1, 1, 1), lambda i: (i, 0, 0))),
        compiler_params=_cparams(("parallel",)),
    )(x)

    count = n * m                       # real element count (padding is zeros)
    total = jnp.sum(sums)
    total_sq = jnp.sum(sumsqs)
    mean = total / count
    var = (total_sq - count * mean * mean) / (count - 1)   # torch.std: ddof=1
    inv_std = lax.rsqrt(jnp.maximum(var, 1e-12))           # guard cancellation
    stats = jnp.stack([mean, inv_std]).astype(_F32)        # (2,) -> SMEM

    # Pass 2: megacore-parallel per-tile partial loss sums; one scalar store
    # per grid step (no lane-width-1 (tr,1) blocks, no trailing mean kernel).
    use_diag_slice = tr <= m
    partials = pl.pallas_call(
        functools.partial(_loss_partial_kernel, n_rows=n, n_pad=n_pad,
                          use_diag_slice=use_diag_slice),
        out_shape=jax.ShapeDtypeStruct((grid_n, 1, 1), _F32),
        grid=(grid_n,),
        in_specs=[pl.BlockSpec(memory_space=pltpu.MemorySpace.SMEM),
                  pl.BlockSpec((tr, m), lambda i: (i, 0))],
        out_specs=pl.BlockSpec((1, 1, 1), lambda i: (i, 0, 0)),
        compiler_params=_cparams(("parallel",)),
    )(stats, x)

    return jnp.sum(partials) / n


# --------------------------------------------------------------------------
# Pure-JAX reference mirroring the PyTorch module (method='origin').
# --------------------------------------------------------------------------
def nce_softmax_loss_ref(x):
    x = x.astype(jnp.float32)
    n, m = x.shape
    mean = jnp.mean(x)
    std = jnp.sqrt(jnp.sum((x - mean) ** 2) / (x.size - 1))   # torch.std (ddof=1)
    xn = (x - mean) / std
    ex = jnp.exp(xn)
    eye = jnp.eye(n, m, dtype=jnp.float32)        # origin: diag = positives
    pos = jnp.sum(ex * eye, axis=1)
    neg = jnp.sum(ex * (1.0 - eye), axis=1)
    ng = pos + neg
    return jnp.mean(-jnp.log(pos) + jnp.log(ng))


if __name__ == "__main__":
    key = jax.random.PRNGKey(0)
    k1, k2 = jax.random.split(key)

    # (1) Square, aligned similarity matrix -> fused single-read fast path.
    x = jax.random.normal(k1, (256, 256), dtype=jnp.float32)
    ref = nce_softmax_loss_ref(x)
    loss_fast = jax.block_until_ready(nce_softmax_loss_origin(x))
    assert jnp.allclose(loss_fast, ref, rtol=1e-4, atol=1e-4), (loss_fast, ref)

    # (2) Forced two-pass tiled path (grid of 2): exercises parallel partial
    #     sums, SMEM stats and the [TR, TR] diagonal-window slice.
    loss_tiled = jax.block_until_ready(
        nce_softmax_loss_origin(x, tile_rows=128, force_two_pass=True))
    assert jnp.allclose(loss_tiled, ref, rtol=1e-4, atol=1e-4), (loss_tiled, ref)

    # (3) Non-multiple-of-8 row count -> wrapper zero-pads, kernels mask the
    #     pad rows; check both the fused and the two-pass path.
    x2 = jax.random.normal(k2, (252, 252), dtype=jnp.float32)
    ref2 = nce_softmax_loss_ref(x2)
    loss2_fast = jax.block_until_ready(nce_softmax_loss_origin(x2))
    assert jnp.allclose(loss2_fast, ref2, rtol=1e-4, atol=1e-4), (loss2_fast, ref2)
    loss2_tiled = jax.block_until_ready(
        nce_softmax_loss_origin(x2, force_two_pass=True))
    assert jnp.allclose(loss2_tiled, ref2, rtol=1e-4, atol=1e-4), (loss2_tiled, ref2)

    # (4) bf16 input: DMA'd as bf16 (half the HBM bytes), upcast in VMEM.
    xb = x.astype(jnp.bfloat16)
    refb = nce_softmax_loss_ref(xb)
    lossb = jax.block_until_ready(nce_softmax_loss_origin(xb))
    assert jnp.allclose(lossb, refb, rtol=2e-3, atol=2e-3), (lossb, refb)

    print("KERNEL_OK")
</pallas_src>

<mosaic_0001>
module attributes {stable_mosaic.version = 11 : i64} {
  func.func @_fused_kernel(%arg0: i32, %arg1: memref<256x256xf32, #tpu.memory_space<vmem>>, %arg2: memref<1x1xf32, #tpu.memory_space<vmem>>) attributes {dimension_semantics = [#tpu.dimension_semantics<arbitrary>], iteration_bounds = array<i64: 1>, scalar_prefetch = 0 : i64, scratch_operands = 0 : i64, tpu.core_type = #tpu.core_type<tc>, window_params = [{pipeline_mode = #tpu.pipeline_mode<synchronous>, transform_indices = @transform_0, window_bounds = array<i64: 256, 256>}, {pipeline_mode = #tpu.pipeline_mode<synchronous>, transform_indices = @transform_1, window_bounds = array<i64: 1, 1>}]} {
    %c0 = arith.constant 0 : index
    %c0_0 = arith.constant 0 : index
    %0 = vector.load %arg1[%c0, %c0_0] : memref<256x256xf32, #tpu.memory_space<vmem>>, vector<256x256xf32>
    %1 = vector.shape_cast %0 : vector<256x256xf32> to vector<1x256x256xf32>
    %cst = arith.constant dense<0.000000e+00> : vector<1xf32>
    %2 = vector.multi_reduction <add>, %1, %cst [1, 2] : vector<1x256x256xf32> to vector<1xf32>
    %3 = vector.shape_cast %2 : vector<1xf32> to vector<1x1x1xf32>
    %4 = vector.extract %3[0, 0, 0] : f32 from vector<1x1x1xf32>
    %cst_1 = arith.constant 6.553600e+04 : f32
    %5 = arith.divf %4, %cst_1 : f32
    %6 = vector.broadcast %5 : f32 to vector<256x256xf32>
    %7 = arith.subf %0, %6 : vector<256x256xf32>
    %8 = arith.mulf %7, %7 : vector<256x256xf32>
    %9 = vector.shape_cast %8 : vector<256x256xf32> to vector<1x256x256xf32>
    %cst_2 = arith.constant dense<0.000000e+00> : vector<1xf32>
    %10 = vector.multi_reduction <add>, %9, %cst_2 [1, 2] : vector<1x256x256xf32> to vector<1xf32>
    %11 = vector.shape_cast %10 : vector<1xf32> to vector<1x1x1xf32>
    %12 = vector.extract %11[0, 0, 0] : f32 from vector<1x1x1xf32>
    %cst_3 = arith.constant 6.553500e+04 : f32
    %13 = arith.divf %12, %cst_3 : f32
    %cst_4 = arith.constant 9.99999996E-13 : f32
    %14 = arith.maximumf %13, %cst_4 : f32
    %15 = math.rsqrt %14 : f32
    %16 = vector.broadcast %15 : f32 to vector<256x256xf32>
    %17 = arith.mulf %7, %16 : vector<256x256xf32>
    %cst_5 = arith.constant dense<0xFF800000> : vector<256xf32>
    %18 = vector.multi_reduction <maximumf>, %17, %cst_5 [1] : vector<256x256xf32> to vector<256xf32>
    %19 = vector.shape_cast %18 : vector<256xf32> to vector<256x1xf32>
    %20 = vector.broadcast %19 : vector<256x1xf32> to vector<256x256xf32>
    %21 = arith.subf %17, %20 : vector<256x256xf32>
    %22 = math.exp %21 : vector<256x256xf32>
    %cst_6 = arith.constant dense<0.000000e+00> : vector<256xf32>
    %23 = vector.multi_reduction <add>, %22, %cst_6 [1] : vector<256x256xf32> to vector<256xf32>
    %24 = vector.shape_cast %23 : vector<256xf32> to vector<256x1xf32>
    %25 = math.log %24 : vector<256x1xf32>
    %26 = arith.addf %19, %25 : vector<256x1xf32>
    %27 = tpu.iota {dimensions = array<i32: 0>} : vector<256x1xi32>
    %28 = tpu.iota {dimensions = array<i32: 1>} : vector<256x256xi32>
    %29 = vector.broadcast %27 : vector<256x1xi32> to vector<256x256xi32>
    %30 = arith.cmpi eq, %28, %29 : vector<256x256xi32>
    %cst_7 = arith.constant 0.000000e+00 : f32
    %31 = vector.broadcast %cst_7 : f32 to vector<256x256xf32>
    %32 = arith.select %30, %17, %31 : vector<256x256xi1>, vector<256x256xf32>
    %cst_8 = arith.constant dense<0.000000e+00> : vector<256xf32>
    %33 = vector.multi_reduction <add>, %32, %cst_8 [1] : vector<256x256xf32> to vector<256xf32>
    %34 = vector.shape_cast %33 : vector<256xf32> to vector<256x1xf32>
    %35 = arith.subf %26, %34 : vector<256x1xf32>
    %36 = vector.shape_cast %35 : vector<256x1xf32> to vector<1x256x1xf32>
    %cst_9 = arith.constant dense<0.000000e+00> : vector<1xf32>
    %37 = vector.multi_reduction <add>, %36, %cst_9 [1, 2] : vector<1x256x1xf32> to vector<1xf32>
    %38 = vector.shape_cast %37 : vector<1xf32> to vector<1x1x1xf32>
    %39 = vector.extract %38[0, 0, 0] : f32 from vector<1x1x1xf32>
    %cst_10 = arith.constant 2.560000e+02 : f32
    %40 = arith.divf %39, %cst_10 : f32
    %cst_11 = arith.constant 1.000000e+00 : f32
    %41 = vector.broadcast %cst_11 : f32 to vector<1x1xf32>
    %42 = vector.broadcast %40 : f32 to vector<1x1xf32>
    %43 = arith.mulf %42, %41 : vector<1x1xf32>
    %c0_12 = arith.constant 0 : index
    %c0_13 = arith.constant 0 : index
    %44 = vector.load %arg2[%c0_12, %c0_13] : memref<1x1xf32, #tpu.memory_space<vmem>>, vector<1x1xf32>
    tpu.vector_store %arg2[%c0_12, %c0_13], %43 {strides = array<i32>} : memref<1x1xf32, #tpu.memory_space<vmem>>, vector<1x1xf32>,
    return
  }
  func.func @transform_0(%arg0: i32) -> (i32, i32) {
    %c0_i32 = arith.constant 0 : i32
    %c0_i32_0 = arith.constant 0 : i32
    %c0_i32_1 = arith.constant 0 : i32
    return %c0_i32, %c0_i32_0 : i32, i32
  }
  func.func @transform_1(%arg0: i32) -> (i32, i32) {
    %c0_i32 = arith.constant 0 : i32
    %c0_i32_0 = arith.constant 0 : i32
    %c0_i32_1 = arith.constant 0 : i32
    return %c0_i32, %c0_i32_0 : i32, i32
  }
}

</mosaic_0001>

<bundles_post_ra>
// kernel: tpu_custom_call.1
= control target key start
LH: loop header
LB: loop body
LE: loop exit
PB: predicated region body
PF: predicated region fallthrough
CT: control target
= control target key end

     0   :  { %6 = vsyncpa [#allocation3], 0  ;;  %s3070_s0 = inlined_call_operand.hbm [shape: f32[256,256], index: 0, kind: input, shape index: {}]   ;;  %s3071_s1 = inlined_call_operand.hbm [shape: f32[1,1], index: 1, kind: output, shape index: {}]  }
   0x1   :  { %7 = vsyncpa [#allocation4], 0  ;;  %s1556_s6 = smov [#allocation2]   ;;  %s1508_s10 = scalar_lea.hbm %s3070_s0, 8192 }
   0x2   :  { %s13_s7 = sshll.u32 %s1556_s6, 4  ;;  %p1509_p0 = scmp.ne.s32.totalorder %s3070_s0, %s1508_s10  ;;  %s14_s7 = int_to_ptr.vmem [resolvable:$true] %s13_s7 }
   0x3   :  { %p1512_p1 = scmp.lt.u32.totalorder %s1508_s10, %s3070_s0 }
   0x5   :  { %p1514_p2 = pnand %p1512_p1, %p1509_p0 }
   0x7   :  { %1517 = shalt.err (!%p1514_p2)
}
   0x8   :  { %s1518_s15 = scalar_lea.vmem %s14_s7, 8192  ;;  %p1523_p4 = scmp.lt.s32.totalorder %s14_s7, %s14_s7 }
   0x9   :  { %p1519_p3 = scmp.ne.s32.totalorder %s14_s7, %s1518_s15  ;;  %p1524_p5 = scmp.lt.s32.totalorder %s1518_s15, %s1518_s15 }
   0xb   :  { %p1525_p6 = por %p1524_p5, %p1523_p4 }
   0xd   :  { %p1526_p7 = pnand %p1525_p6, %p1519_p3 }
   0xf   :  { %1529 = shalt.err (!%p1526_p7)
}
  0x10   :  { %s1557_s16 = smov 256   ;;  %s1558_s17 = smov 16  }
  0x11   :  { %19 = dma.hbm_to_vmem [thread:$0]  %s3070_s0, 8192, %s14_s7, [#allocation3], %s1557_s16, %s1557_s16, %s1558_s17  }
  0x12   :  { %1552 = dma.done.wait [#allocation3], 8192  }
  0x13   :  { %1553 = vsyncadd [#allocation3], 4294959104  ;;  %v1583_v0 = vld [vmem:[#allocation2] sm:$0xff]  ;;  %v1585_v1 = vld [vmem:[#allocation2 + $0x8] sm:$0xff]  ;;  %s1559_s23 = smov 1e-12  }
  0x14   :  { %v1587_v2 = vld [vmem:[#allocation2 + $0x10] sm:$0xff]  ;;  %v87_v3 = vadd.f32 %v1585_v1, %v1583_v0  ;;  %v1591_v4 = vld [vmem:[#allocation2 + $0x18] sm:$0xff]  ;;  %v1594_v6 = vld [vmem:[#allocation2 + $0x20] sm:$0xff]  ;;  %s1560_s26 = smov [#allocation5]  }
  0x15   :  { %v1597_v8 = vld [vmem:[#allocation2 + $0x28] sm:$0xff]  ;;  %v1600_v10 = vld [vmem:[#allocation2 + $0x30] sm:$0xff]  ;;  %v1603_v12 = vld [vmem:[#allocation2 + $0x38] sm:$0xff]  ;;  %s1292_s27 = sshll.u32 %s1560_s26, 4  ;;  %s1293_s27 = int_to_ptr.vmem [resolvable:$true] %s1292_s27 }
  0x16   :  { %v88_v5 = vadd.f32 %v87_v3, %v1587_v2  ;;  %v1606_v14 = vld [vmem:[#allocation2 + $0x40] sm:$0xff]  ;;  %v1609_v16 = vld [vmem:[#allocation2 + $0x48] sm:$0xff]  ;;  %v1612_v18 = vld [vmem:[#allocation2 + $0x50] sm:$0xff]  ;;  %s1530_s30 = scalar_lea.vmem %s1293_s27, 16  ;;  %s1534_s2 = scalar_lea.vmem %s1293_s27, 32 }
  0x17   :  { %v1615_v20 = vld [vmem:[#allocation2 + $0x58] sm:$0xff]  ;;  %v1618_v22 = vld [vmem:[#allocation2 + $0x60] sm:$0xff]  ;;  %v1621_v24 = vld [vmem:[#allocation2 + $0x68] sm:$0xff]  ;;  %p1531_p8 = scmp.ne.s32.totalorder %s1293_s27, %s1530_s30  ;;  %p1535_p9 = scmp.lt.s32.totalorder %s1293_s27, %s1293_s27 }
  0x18   :  { %v89_v7 = vadd.f32 %v88_v5, %v1591_v4  ;;  %v1624_v26 = vld [vmem:[#allocation2 + $0x70] sm:$0xff]  ;;  %v1627_v28 = vld [vmem:[#allocation2 + $0x78] sm:$0xff]  ;;  %v1630_v30 = vld [vmem:[#allocation2 + $0x80] sm:$0xff]  ;;  %p1536_p10 = scmp.lt.s32.totalorder %s1534_s2, %s1530_s30 }
  0x19   :  { %v1633_v32 = vld [vmem:[#allocation2 + $0x88] sm:$0xff]  ;;  %v1636_v34 = vld [vmem:[#allocation2 + $0x90] sm:$0xff]  ;;  %v1639_v36 = vld [vmem:[#allocation2 + $0x98] sm:$0xff] }
  0x1a   :  { %v90_v9 = vadd.f32 %v89_v7, %v1594_v6  ;;  %v1642_v38 = vld [vmem:[#allocation2 + $0xa0] sm:$0xff]  ;;  %v1645_v40 = vld [vmem:[#allocation2 + $0xa8] sm:$0xff]  ;;  %v1648_v42 = vld [vmem:[#allocation2 + $0xb0] sm:$0xff]  ;;  %p1537_p11 = por %p1536_p10, %p1535_p9 }
  0x1b   :  { %v1651_v44 = vld [vmem:[#allocation2 + $0xb8] sm:$0xff]  ;;  %v1654_v46 = vld [vmem:[#allocation2 + $0xc0] sm:$0xff]  ;;  %v1657_v48 = vld [vmem:[#allocation2 + $0xc8] sm:$0xff] }
  0x1c   :  { %v91_v11 = vadd.f32 %v90_v9, %v1597_v8  ;;  %v1660_v50 = vld [vmem:[#allocation2 + $0xd0] sm:$0xff]  ;;  %v1663_v52 = vld [vmem:[#allocation2 + $0xd8] sm:$0xff]  ;;  %v1666_v54 = vld [vmem:[#allocation2 + $0xe0] sm:$0xff]  ;;  %p1538_p12 = pnand %p1537_p11, %p1531_p8 }
  0x1d   :  { %v1669_v56 = vld [vmem:[#allocation2 + $0xe8] sm:$0xff]  ;;  %v1672_v58 = vld [vmem:[#allocation2 + $0xf0] sm:$0xff]  ;;  %v1675_v60 = vld [vmem:[#allocation2 + $0xf8] sm:$0xff] }
  0x1e   :  { %v92_v13 = vadd.f32 %v91_v11, %v1600_v10  ;;  %v1678_v62 = vld [vmem:[#allocation2 + $0x100] sm:$0xff]  ;;  %v1681_v3 = vld [vmem:[#allocation2 + $0x108] sm:$0xff]  ;;  %v1684_v7 = vld [vmem:[#allocation2 + $0x110] sm:$0xff] }
  0x1f   :  { %v1687_v11 = vld [vmem:[#allocation2 + $0x118] sm:$0xff] }
  0x20   :  { %v93_v15 = vadd.f32 %v92_v13, %v1603_v12 }
  0x22   :  { %v94_v17 = vadd.f32 %v93_v15, %v1606_v14  ;;  %v1690_v15 = vld [vmem:[#allocation2 + $0x120] sm:$0xff] }
  0x24   :  { %v95_v19 = vadd.f32 %v94_v17, %v1609_v16 }
  0x26   :  { %v96_v21 = vadd.f32 %v95_v19, %v1612_v18  ;;  %v1693_v19 = vld [vmem:[#allocation2 + $0x128] sm:$0xff] }
  0x28   :  { %v97_v23 = vadd.f32 %v96_v21, %v1615_v20 }
  0x2a   :  { %v98_v25 = vadd.f32 %v97_v23, %v1618_v22  ;;  %v1696_v23 = vld [vmem:[#allocation2 + $0x130] sm:$0xff] }
  0x2c   :  { %v99_v27 = vadd.f32 %v98_v25, %v1621_v24 }
  0x2e   :  { %v100_v29 = vadd.f32 %v99_v27, %v1624_v26  ;;  %v1699_v27 = vld [vmem:[#allocation2 + $0x138] sm:$0xff] }
  0x30   :  { %v101_v31 = vadd.f32 %v100_v29, %v1627_v28 }
  0x32   :  { %v102_v33 = vadd.f32 %v101_v31, %v1630_v30  ;;  %v1702_v31 = vld [vmem:[#allocation2 + $0x140] sm:$0xff] }
  0x34   :  { %v103_v35 = vadd.f32 %v102_v33, %v1633_v32 }
  0x36   :  { %v104_v37 = vadd.f32 %v103_v35, %v1636_v34  ;;  %v1705_v35 = vld [vmem:[#allocation2 + $0x148] sm:$0xff] }
  0x38   :  { %v105_v39 = vadd.f32 %v104_v37, %v1639_v36 }
  0x3a   :  { %v106_v41 = vadd.f32 %v105_v39, %v1642_v38  ;;  %v1708_v39 = vld [vmem:[#allocation2 + $0x150] sm:$0xff] }
  0x3c   :  { %v107_v43 = vadd.f32 %v106_v41, %v1645_v40 }
  0x3e   :  { %v108_v45 = vadd.f32 %v107_v43, %v1648_v42  ;;  %v1711_v43 = vld [vmem:[#allocation2 + $0x158] sm:$0xff] }
  0x40   :  { %v109_v47 = vadd.f32 %v108_v45, %v1651_v44 }
  0x42   :  { %v110_v49 = vadd.f32 %v109_v47, %v1654_v46  ;;  %v1714_v47 = vld [vmem:[#allocation2 + $0x160] sm:$0xff] }
  0x44   :  { %v111_v51 = vadd.f32 %v110_v49, %v1657_v48 }
  0x46   :  { %v112_v53 = vadd.f32 %v111_v51, %v1660_v50  ;;  %v1717_v51 = vld [vmem:[#allocation2 + $0x168] sm:$0xff] }
  0x48   :  { %v113_v55 = vadd.f32 %v112_v53, %v1663_v52 }
  0x4a   :  { %v114_v57 = vadd.f32 %v113_v55, %v1666_v54  ;;  %v1720_v55 = vld [vmem:[#allocation2 + $0x170] sm:$0xff] }
  0x4c   :  { %v115_v59 = vadd.f32 %v114_v57, %v1669_v56 }
  0x4e   :  { %v116_v61 = vadd.f32 %v115_v59, %v1672_v58  ;;  %v1723_v59 = vld [vmem:[#allocation2 + $0x178] sm:$0xff] }
  0x50   :  { %v117_v63 = vadd.f32 %v116_v61, %v1675_v60 }
  0x52   :  { %v118_v5 = vadd.f32 %v117_v63, %v1678_v62  ;;  %v1726_v63 = vld [vmem:[#allocation2 + $0x180] sm:$0xff] }
  0x53   :  { %3146 = vst [vmem:[#allocation8_spill] sm:$0xff] %v1726_v63 }
  0x54   :  { %v119_v9 = vadd.f32 %v118_v5, %v1681_v3 }
  0x56   :  { %v120_v13 = vadd.f32 %v119_v9, %v1684_v7  ;;  %v1729_v9 = vld [vmem:[#allocation2 + $0x188] sm:$0xff] }
  0x57   :  { %3147 = vst [vmem:[#allocation9_spill] sm:$0xff] %v1729_v9 }
  0x58   :  { %v121_v17 = vadd.f32 %v120_v13, %v1687_v11 }
  0x5a   :  { %v122_v21 = vadd.f32 %v121_v17, %v1690_v15  ;;  %v1732_v17 = vld [vmem:[#allocation2 + $0x190] sm:$0xff] }
  0x5b   :  { %3148 = vst [vmem:[#allocation10_spill] sm:$0xff] %v1732_v17 }
  0x5c   :  { %v123_v25 = vadd.f32 %v122_v21, %v1693_v19 }
  0x5e   :  { %v124_v29 = vadd.f32 %v123_v25, %v1696_v23  ;;  %v1735_v25 = vld [vmem:[#allocation2 + $0x198] sm:$0xff] }
  0x5f   :  { %3149 = vst [vmem:[#allocation11_spill] sm:$0xff] %v1735_v25 }
  0x60   :  { %v125_v33 = vadd.f32 %v124_v29, %v1699_v27 }
  0x62   :  { %v126_v37 = vadd.f32 %v125_v33, %v1702_v31  ;;  %v1738_v33 = vld [vmem:[#allocation2 + $0x1a0] sm:$0xff] }
  0x63   :  { %3150 = vst [vmem:[#allocation12_spill] sm:$0xff] %v1738_v33 }
  0x64   :  { %v127_v41 = vadd.f32 %v126_v37, %v1705_v35 }
  0x66   :  { %v128_v45 = vadd.f32 %v127_v41, %v1708_v39  ;;  %v1741_v41 = vld [vmem:[#allocation2 + $0x1a8] sm:$0xff] }
  0x67   :  { %3151 = vst [vmem:[#allocation13_spill] sm:$0xff] %v1741_v41 }
  0x68   :  { %v129_v49 = vadd.f32 %v128_v45, %v1711_v43 }
  0x6a   :  { %v130_v53 = vadd.f32 %v129_v49, %v1714_v47  ;;  %v1744_v49 = vld [vmem:[#allocation2 + $0x1b0] sm:$0xff] }
  0x6b   :  { %3152 = vst [vmem:[#allocation14_spill] sm:$0xff] %v1744_v49 }
  0x6c   :  { %v131_v57 = vadd.f32 %v130_v53, %v1717_v51 }
  0x6e   :  { %v132_v61 = vadd.f32 %v131_v57, %v1720_v55  ;;  %v1747_v57 = vld [vmem:[#allocation2 + $0x1b8] sm:$0xff] }
  0x6f   :  { %3153 = vst [vmem:[#allocation15_spill] sm:$0xff] %v1747_v57 }
  0x70   :  { %v133_v5 = vadd.f32 %v132_v61, %v1723_v59 }
  0x72   :  { %v134_v13 = vadd.f32 %v133_v5, %v1726_v63  ;;  %v1750_v5 = vld [vmem:[#allocation2 + $0x1c0] sm:$0xff] }
  0x73   :  { %3154 = vst [vmem:[#allocation16_spill] sm:$0xff] %v1750_v5 }
  0x74   :  { %v135_v21 = vadd.f32 %v134_v13, %v1729_v9 }
  0x76   :  { %v136_v29 = vadd.f32 %v135_v21, %v1732_v17  ;;  %v1753_v21 = vld [vmem:[#allocation2 + $0x1c8] sm:$0xff] }
  0x77   :  { %3155 = vst [vmem:[#allocation17_spill] sm:$0xff] %v1753_v21 }
  0x78   :  { %v137_v37 = vadd.f32 %v136_v29, %v1735_v25  ;;  %v1756_v25 = vld [vmem:[#allocation2 + $0x1d0] sm:$0xff] }
  0x79   :  { %3156 = vst [vmem:[#allocation18_spill] sm:$0xff] %v1756_v25 }
  0x7a   :  { %v138_v45 = vadd.f32 %v137_v37, %v1738_v33  ;;  %v1759_v33 = vld [vmem:[#allocation2 + $0x1d8] sm:$0xff] }
  0x7b   :  { %3157 = vst [vmem:[#allocation19_spill] sm:$0xff] %v1759_v33 }
  0x7c   :  { %v139_v53 = vadd.f32 %v138_v45, %v1741_v41  ;;  %v1762_v41 = vld [vmem:[#allocation2 + $0x1e0] sm:$0xff] }
  0x7e   :  { %v140_v61 = vadd.f32 %v139_v53, %v1744_v49  ;;  %v1765_v49 = vld [vmem:[#allocation2 + $0x1e8] sm:$0xff] }
  0x80   :  { %v141_v13 = vadd.f32 %v140_v61, %v1747_v57  ;;  %v1768_v57 = vld [vmem:[#allocation2 + $0x1f0] sm:$0xff] }
  0x82   :  { %v142_v29 = vadd.f32 %v141_v13, %v1750_v5  ;;  %v1771_v5 = vld [vmem:[#allocation2 + $0x1f8] sm:$0xff] }
  0x84   :  { %v143_v37 = vadd.f32 %v142_v29, %v1753_v21 }
  0x86   :  { %v144_v45 = vadd.f32 %v143_v37, %v1756_v25 }
  0x88   :  { %v145_v53 = vadd.f32 %v144_v45, %v1759_v33 }
  0x8a   :  { %v146_v61 = vadd.f32 %v145_v53, %v1762_v41 }
  0x8c   :  { %v147_v13 = vadd.f32 %v146_v61, %v1765_v49 }
  0x8e   :  { %v148_v29 = vadd.f32 %v147_v13, %v1768_v57 }
  0x90   :  { %v149_v21 = vadd.f32 %v148_v29, %v1771_v5 }
  0x92   :  { %150 = vadd.xlane.f32.xlu0 %v149_v21 }
 0x11f   :  { %v151_v37 = vpop.xlane.xlu0 %150 }
 0x120   :  { %v152_v25 = vrot.slane %v151_v37, 4 }
 0x122   :  { %v153_v17 = vadd.f32 %v152_v25, %v151_v37 }
 0x124   :  { %v154_v9 = vrot.slane %v153_v17, 2 }
 0x126   :  { %v155_v45 = vadd.f32 %v154_v9, %v153_v17 }
 0x128   :  { %v156_v33 = vrot.slane %v155_v45, 1 }
 0x12a   :  { %v157_v63 = vadd.f32 %v156_v33, %v155_v45 }
 0x12c   :  { %1301 = vpush %v157_v63 }
 0x15d   :  { %s1302_s0 = spop %1301 }
 0x15e   :  { %s161_s20 = smul.f32 1.5258789e-05, %s1302_s0 }
 0x160   :  { %v1775_v53 = vstv %s161_s20 }
 0x161   :  { %v1779_v61 = vsub.f32 %v1583_v0, %v1775_v53  ;;  %v1783_v13 = vsub.f32 %v1585_v1, %v1775_v53  ;;  %v1787_v25 = vsub.f32 %v1587_v2, %v1775_v53  ;;  %v1795_v17 = vsub.f32 %v1591_v4, %v1775_v53 }
 0x162   :  { %v1799_v0 = vsub.f32 %v1594_v6, %v1775_v53  ;;  %v1805_v2 = vsub.f32 %v1597_v8, %v1775_v53  ;;  %v1811_v4 = vsub.f32 %v1600_v10, %v1775_v53  ;;  %v1817_v45 = vsub.f32 %v1603_v12, %v1775_v53 }
 0x163   :  { %v227_v9 = vmul.f32 %v1779_v61, %v1779_v61  ;;  %v228_v63 = vmul.f32 %v1783_v13, %v1783_v13  ;;  %v229_v1 = vmul.f32 %v1787_v25, %v1787_v25  ;;  %v230_v21 = vmul.f32 %v1795_v17, %v1795_v17 }
 0x164   :  { %v231_v6 = vmul.f32 %v1799_v0, %v1799_v0  ;;  %v232_v8 = vmul.f32 %v1805_v2, %v1805_v2  ;;  %v233_v10 = vmul.f32 %v1811_v4, %v1811_v4  ;;  %v234_v12 = vmul.f32 %v1817_v45, %v1817_v45 }
 0x165   :  { %v291_v33 = vadd.f32 %v228_v63, %v227_v9  ;;  %v1823_v63 = vsub.f32 %v1606_v14, %v1775_v53 }
 0x167   :  { %v292_v29 = vadd.f32 %v291_v33, %v229_v1  ;;  %v1829_v33 = vsub.f32 %v1609_v16, %v1775_v53  ;;  %v235_v14 = vmul.f32 %v1823_v63, %v1823_v63 }
 0x169   :  { %v293_v37 = vadd.f32 %v292_v29, %v230_v21  ;;  %v1835_v29 = vsub.f32 %v1612_v18, %v1775_v53  ;;  %v236_v16 = vmul.f32 %v1829_v33, %v1829_v33 }
 0x16b   :  { %v294_v9 = vadd.f32 %v293_v37, %v231_v6  ;;  %v1841_v37 = vsub.f32 %v1615_v20, %v1775_v53  ;;  %v237_v18 = vmul.f32 %v1835_v29, %v1835_v29 }
 0x16d   :  { %v295_v1 = vadd.f32 %v294_v9, %v232_v8  ;;  %v1847_v9 = vsub.f32 %v1618_v22, %v1775_v53  ;;  %v238_v20 = vmul.f32 %v1841_v37, %v1841_v37 }
 0x16f   :  { %v296_v21 = vadd.f32 %v295_v1, %v233_v10  ;;  %v1853_v1 = vsub.f32 %v1621_v24, %v1775_v53  ;;  %v239_v22 = vmul.f32 %v1847_v9, %v1847_v9 }
 0x171   :  { %v297_v6 = vadd.f32 %v296_v21, %v234_v12  ;;  %v1859_v21 = vsub.f32 %v1624_v26, %v1775_v53  ;;  %v240_v24 = vmul.f32 %v1853_v1, %v1853_v1 }
 0x173   :  { %v298_v8 = vadd.f32 %v297_v6, %v235_v14  ;;  %v1865_v6 = vsub.f32 %v1627_v28, %v1775_v53  ;;  %v241_v26 = vmul.f32 %v1859_v21, %v1859_v21 }
 0x175   :  { %v299_v10 = vadd.f32 %v298_v8, %v236_v16  ;;  %v1871_v8 = vsub.f32 %v1630_v30, %v1775_v53  ;;  %v242_v28 = vmul.f32 %v1865_v6, %v1865_v6 }
 0x177   :  { %v300_v12 = vadd.f32 %v299_v10, %v237_v18  ;;  %v1877_v10 = vsub.f32 %v1633_v32, %v1775_v53  ;;  %v243_v30 = vmul.f32 %v1871_v8, %v1871_v8 }
 0x179   :  { %v301_v14 = vadd.f32 %v300_v12, %v238_v20  ;;  %v1883_v12 = vsub.f32 %v1636_v34, %v1775_v53  ;;  %v244_v32 = vmul.f32 %v1877_v10, %v1877_v10 }
 0x17b   :  { %v302_v16 = vadd.f32 %v301_v14, %v239_v22  ;;  %v1889_v14 = vsub.f32 %v1639_v36, %v1775_v53  ;;  %v245_v34 = vmul.f32 %v1883_v12, %v1883_v12 }
 0x17d   :  { %v303_v18 = vadd.f32 %v302_v16, %v240_v24  ;;  %v1895_v16 = vsub.f32 %v1642_v38, %v1775_v53  ;;  %v246_v36 = vmul.f32 %v1889_v14, %v1889_v14 }
 0x17f   :  { %v304_v20 = vadd.f32 %v303_v18, %v241_v26  ;;  %v1901_v18 = vsub.f32 %v1645_v40, %v1775_v53  ;;  %v247_v38 = vmul.f32 %v1895_v16, %v1895_v16 }
 0x181   :  { %v305_v22 = vadd.f32 %v304_v20, %v242_v28  ;;  %v1907_v20 = vsub.f32 %v1648_v42, %v1775_v53  ;;  %v248_v40 = vmul.f32 %v1901_v18, %v1901_v18 }
 0x183   :  { %v306_v24 = vadd.f32 %v305_v22, %v243_v30  ;;  %v1913_v22 = vsub.f32 %v1651_v44, %v1775_v53  ;;  %v249_v42 = vmul.f32 %v1907_v20, %v1907_v20 }
 0x185   :  { %v307_v26 = vadd.f32 %v306_v24, %v244_v32  ;;  %v1919_v24 = vsub.f32 %v1654_v46, %v1775_v53  ;;  %v250_v44 = vmul.f32 %v1913_v22, %v1913_v22 }
 0x187   :  { %v308_v28 = vadd.f32 %v307_v26, %v245_v34  ;;  %v1925_v26 = vsub.f32 %v1657_v48, %v1775_v53  ;;  %v251_v46 = vmul.f32 %v1919_v24, %v1919_v24 }
 0x189   :  { %v309_v30 = vadd.f32 %v308_v28, %v246_v36  ;;  %v1931_v28 = vsub.f32 %v1660_v50, %v1775_v53  ;;  %v252_v48 = vmul.f32 %v1925_v26, %v1925_v26 }
 0x18b   :  { %v310_v32 = vadd.f32 %v309_v30, %v247_v38  ;;  %v1937_v30 = vsub.f32 %v1663_v52, %v1775_v53  ;;  %v253_v50 = vmul.f32 %v1931_v28, %v1931_v28 }
 0x18d   :  { %v311_v34 = vadd.f32 %v310_v32, %v248_v40  ;;  %v1943_v32 = vsub.f32 %v1666_v54, %v1775_v53  ;;  %v254_v52 = vmul.f32 %v1937_v30, %v1937_v30 }
 0x18f   :  { %v312_v36 = vadd.f32 %v311_v34, %v249_v42  ;;  %v1949_v34 = vsub.f32 %v1669_v56, %v1775_v53  ;;  %v255_v54 = vmul.f32 %v1943_v32, %v1943_v32 }
 0x191   :  { %v313_v38 = vadd.f32 %v312_v36, %v250_v44  ;;  %v1955_v36 = vsub.f32 %v1672_v58, %v1775_v53  ;;  %v256_v56 = vmul.f32 %v1949_v34, %v1949_v34 }
 0x193   :  { %v314_v40 = vadd.f32 %v313_v38, %v251_v46  ;;  %v1961_v38 = vsub.f32 %v1675_v60, %v1775_v53  ;;  %v257_v58 = vmul.f32 %v1955_v36, %v1955_v36 }
 0x195   :  { %v315_v42 = vadd.f32 %v314_v40, %v252_v48  ;;  %v1967_v40 = vsub.f32 %v1678_v62, %v1775_v53  ;;  %v258_v60 = vmul.f32 %v1961_v38, %v1961_v38 }
 0x197   :  { %v316_v44 = vadd.f32 %v315_v42, %v253_v50  ;;  %v1973_v42 = vsub.f32 %v1681_v3, %v1775_v53  ;;  %v259_v62 = vmul.f32 %v1967_v40, %v1967_v40 }
 0x199   :  { %v317_v46 = vadd.f32 %v316_v44, %v254_v52  ;;  %v1979_v44 = vsub.f32 %v1684_v7, %v1775_v53  ;;  %v260_v3 = vmul.f32 %v1973_v42, %v1973_v42 }
 0x19b   :  { %v318_v48 = vadd.f32 %v317_v46, %v255_v54  ;;  %v1985_v46 = vsub.f32 %v1687_v11, %v1775_v53  ;;  %v261_v7 = vmul.f32 %v1979_v44, %v1979_v44 }
 0x19d   :  { %v319_v50 = vadd.f32 %v318_v48, %v256_v56  ;;  %v1991_v48 = vsub.f32 %v1690_v15, %v1775_v53  ;;  %v262_v11 = vmul.f32 %v1985_v46, %v1985_v46 }
 0x19f   :  { %v320_v52 = vadd.f32 %v319_v50, %v257_v58  ;;  %v1997_v50 = vsub.f32 %v1693_v19, %v1775_v53  ;;  %v263_v15 = vmul.f32 %v1991_v48, %v1991_v48 }
 0x1a1   :  { %v321_v54 = vadd.f32 %v320_v52, %v258_v60  ;;  %3158 = vst [vmem:[#allocation20_spill] sm:$0xff] %v1997_v50  ;;  %v2003_v52 = vsub.f32 %v1696_v23, %v1775_v53  ;;  %v264_v19 = vmul.f32 %v1997_v50, %v1997_v50 }
 0x1a3   :  { %v322_v56 = vadd.f32 %v321_v54, %v259_v62  ;;  %v2009_v54 = vsub.f32 %v1699_v27, %v1775_v53  ;;  %v265_v23 = vmul.f32 %v2003_v52, %v2003_v52 }
 0x1a5   :  { %v323_v58 = vadd.f32 %v322_v56, %v260_v3  ;;  %v2015_v56 = vsub.f32 %v1702_v31, %v1775_v53  ;;  %v266_v27 = vmul.f32 %v2009_v54, %v2009_v54 }
 0x1a7   :  { %v324_v60 = vadd.f32 %v323_v58, %v261_v7  ;;  %3159 = vst [vmem:[#allocation21_spill] sm:$0xff] %v2015_v56  ;;  %v2021_v58 = vsub.f32 %v1705_v35, %v1775_v53  ;;  %v267_v31 = vmul.f32 %v2015_v56, %v2015_v56 }
 0x1a9   :  { %v325_v62 = vadd.f32 %v324_v60, %v262_v11  ;;  %3160 = vst [vmem:[#allocation22_spill] sm:$0xff] %v2021_v58  ;;  %v2027_v60 = vsub.f32 %v1708_v39, %v1775_v53  ;;  %v268_v35 = vmul.f32 %v2021_v58, %v2021_v58 }
 0x1ab   :  { %v326_v3 = vadd.f32 %v325_v62, %v263_v15  ;;  %v2033_v62 = vsub.f32 %v1711_v43, %v1775_v53  ;;  %v269_v39 = vmul.f32 %v2027_v60, %v2027_v60 }
 0x1ad   :  { %v327_v7 = vadd.f32 %v326_v3, %v264_v19  ;;  %v2039_v3 = vsub.f32 %v1714_v47, %v1775_v53  ;;  %v270_v43 = vmul.f32 %v2033_v62, %v2033_v62 }
 0x1af   :  { %v328_v11 = vadd.f32 %v327_v7, %v265_v23  ;;  %3161 = vst [vmem:[#allocation23_spill] sm:$0xff] %v2039_v3  ;;  %v2045_v7 = vsub.f32 %v1717_v51, %v1775_v53  ;;  %v271_v47 = vmul.f32 %v2039_v3, %v2039_v3 }
 0x1b1   :  { %v329_v15 = vadd.f32 %v328_v11, %v266_v27  ;;  %3162 = vst [vmem:[#allocation24_spill] sm:$0xff] %v2045_v7  ;;  %v2051_v11 = vsub.f32 %v1720_v55, %v1775_v53  ;;  %v272_v51 = vmul.f32 %v2045_v7, %v2045_v7 }
 0x1b3   :  { %v330_v19 = vadd.f32 %v329_v15, %v267_v31  ;;  %v2057_v15 = vsub.f32 %v1723_v59, %v1775_v53  ;;  %v273_v55 = vmul.f32 %v2051_v11, %v2051_v11 }
 0x1b5   :  { %v331_v23 = vadd.f32 %v330_v19, %v268_v35  ;;  %v3163_v19 = vld [vmem:[#allocation8_spill] sm:$0xff]  ;;  %v274_v59 = vmul.f32 %v2057_v15, %v2057_v15 }
 0x1b6   :  { %v2063_v58 = vsub.f32 %v3163_v19, %v1775_v53  ;;  %v3169_v19 = vld [vmem:[#allocation11_spill] sm:$0xff] }
 0x1b7   :  { %v332_v27 = vadd.f32 %v331_v23, %v269_v39  ;;  %v3165_v23 = vld [vmem:[#allocation9_spill] sm:$0xff]  ;;  %v2081_v56 = vsub.f32 %v3169_v19, %v1775_v53  ;;  %v3175_v19 = vld [vmem:[#allocation14_spill] sm:$0xff] }
 0x1b8   :  { %3164 = vst [vmem:[#allocation8_spill] sm:$0xff] %v2063_v58  ;;  %v2069_v3 = vsub.f32 %v3165_v23, %v1775_v53  ;;  %v3171_v23 = vld [vmem:[#allocation12_spill] sm:$0xff] }
 0x1b9   :  { %v333_v31 = vadd.f32 %v332_v27, %v270_v43  ;;  %v3167_v27 = vld [vmem:[#allocation10_spill] sm:$0xff]  ;;  %3170 = vst [vmem:[#allocation11_spill] sm:$0xff] %v2081_v56  ;;  %v2087_v50 = vsub.f32 %v3171_v23, %v1775_v53  ;;  %v3177_v23 = vld [vmem:[#allocation15_spill] sm:$0xff] }
 0x1ba   :  { %3166 = vst [vmem:[#allocation9_spill] sm:$0xff] %v2069_v3  ;;  %v2075_v7 = vsub.f32 %v3167_v27, %v1775_v53  ;;  %v3173_v27 = vld [vmem:[#allocation13_spill] sm:$0xff] }
 0x1bb   :  { %v334_v35 = vadd.f32 %v333_v31, %v271_v47  ;;  %v275_v47 = vmul.f32 %v2063_v58, %v2063_v58  ;;  %3172 = vst [vmem:[#allocation12_spill] sm:$0xff] %v2087_v50  ;;  %v2093_v58 = vsub.f32 %v3173_v27, %v1775_v53  ;;  %v3178_v27 = vld [vmem:[#allocation16_spill] sm:$0xff] }
 0x1bc   :  { %3168 = vst [vmem:[#allocation10_spill] sm:$0xff] %v2075_v7 }
 0x1bd   :  { %v335_v39 = vadd.f32 %v334_v35, %v272_v51  ;;  %v276_v51 = vmul.f32 %v2069_v3, %v2069_v3  ;;  %3174 = vst [vmem:[#allocation13_spill] sm:$0xff] %v2093_v58  ;;  %v2099_v3 = vsub.f32 %v3175_v19, %v1775_v53  ;;  %v3180_v19 = vld [vmem:[#allocation17_spill] sm:$0xff] }
 0x1bf   :  { %v336_v43 = vadd.f32 %v335_v39, %v273_v55  ;;  %v277_v55 = vmul.f32 %v2075_v7, %v2075_v7  ;;  %3176 = vst [vmem:[#allocation14_spill] sm:$0xff] %v2099_v3  ;;  %v2105_v7 = vsub.f32 %v3177_v23, %v1775_v53  ;;  %v3182_v23 = vld [vmem:[#allocation18_spill] sm:$0xff] }
 0x1c1   :  { %v337_v31 = vadd.f32 %v336_v43, %v274_v59  ;;  %v278_v59 = vmul.f32 %v2081_v56, %v2081_v56  ;;  %v2111_v56 = vsub.f32 %v3178_v27, %v1775_v53  ;;  %v3183_v27 = vld [vmem:[#allocation19_spill] sm:$0xff] }
 0x1c3   :  { %v338_v35 = vadd.f32 %v337_v31, %v275_v47  ;;  %v279_v47 = vmul.f32 %v2087_v50, %v2087_v50  ;;  %3179 = vst [vmem:[#allocation15_spill] sm:$0xff] %v2111_v56  ;;  %v2117_v50 = vsub.f32 %v3180_v19, %v1775_v53  ;;  %v2135_v19 = vsub.f32 %v1762_v41, %v1775_v53 }
 0x1c5   :  { %v339_v39 = vadd.f32 %v338_v35, %v276_v51  ;;  %v280_v51 = vmul.f32 %v2093_v58, %v2093_v58  ;;  %3181 = vst [vmem:[#allocation16_spill] sm:$0xff] %v2117_v50  ;;  %v2123_v58 = vsub.f32 %v3182_v23, %v1775_v53  ;;  %3185 = vst [vmem:[#allocation18_spill] sm:$0xff] %v2135_v19 }
 0x1c6   :  { %v2141_v23 = vsub.f32 %v1765_v49, %v1775_v53  ;;  %v287_v41 = vmul.f32 %v2135_v19, %v2135_v19 }
 0x1c7   :  { %v340_v43 = vadd.f32 %v339_v39, %v277_v55  ;;  %v281_v55 = vmul.f32 %v2099_v3, %v2099_v3  ;;  %v2129_v3 = vsub.f32 %v3183_v27, %v1775_v53  ;;  %v2147_v27 = vsub.f32 %v1768_v57, %v1775_v53 }
 0x1c8   :  { %3186 = vst [vmem:[#allocation19_spill] sm:$0xff] %v2141_v23  ;;  %v288_v49 = vmul.f32 %v2141_v23, %v2141_v23  ;;  %v915_v23 = vlaneseq }
 0x1c9   :  { %v341_v31 = vadd.f32 %v340_v43, %v278_v59  ;;  %v282_v59 = vmul.f32 %v2105_v7, %v2105_v7  ;;  %3184 = vst [vmem:[#allocation17_spill] sm:$0xff] %v2129_v3 }
 0x1cb   :  { %v342_v35 = vadd.f32 %v341_v31, %v279_v47  ;;  %v283_v47 = vmul.f32 %v2111_v56, %v2111_v56 }
 0x1cd   :  { %v343_v39 = vadd.f32 %v342_v35, %v280_v51  ;;  %v284_v51 = vmul.f32 %v2117_v50, %v2117_v50 }
 0x1cf   :  { %v344_v43 = vadd.f32 %v343_v39, %v281_v55  ;;  %v285_v55 = vmul.f32 %v2123_v58, %v2123_v58 }
 0x1d1   :  { %v345_v31 = vadd.f32 %v344_v43, %v282_v59  ;;  %v286_v59 = vmul.f32 %v2129_v3, %v2129_v3 }
 0x1d3   :  { %v346_v35 = vadd.f32 %v345_v31, %v283_v47  ;;  %v2153_v31 = vsub.f32 %v1771_v5, %v1775_v53 }
 0x1d5   :  { %v347_v39 = vadd.f32 %v346_v35, %v284_v51  ;;  %v289_v35 = vmul.f32 %v2147_v27, %v2147_v27  ;;  %v290_v57 = vmul.f32 %v2153_v31, %v2153_v31 }
 0x1d7   :  { %v348_v43 = vadd.f32 %v347_v39, %v285_v55 }
 0x1d9   :  { %v349_v47 = vadd.f32 %v348_v43, %v286_v59 }
 0x1db   :  { %v350_v51 = vadd.f32 %v349_v47, %v287_v41  ;;  %v2161_v41 = vshrl.u32 %v915_v23, 7  ;;  %v2163_v47 = vand.u32 127, %v915_v23 }
 0x1dd   :  { %v351_v55 = vadd.f32 %v350_v51, %v288_v49  ;;  %v2166_v49 = vadd.s32 56, %v2161_v41  ;;  %v2169_v51 = vadd.s32 64, %v2161_v41  ;;  %v2184_v23 = vadd.s32 104, %v2161_v41 }
 0x1de   :  { %vm951_vm15 = vcmp.eq.s32.totalorder %v2163_v47, %v2161_v41 }
 0x1df   :  { %v352_v39 = vadd.f32 %v351_v55, %v289_v35  ;;  %3188 = vst [vmem:[#allocation26_spill] sm:$0xff] %v2184_v23  ;;  %v2187_v35 = vadd.s32 112, %v2161_v41  ;;  %vm965_vm0 = vcmp.eq.s32.totalorder %v2163_v47, %v2166_v49  ;;  %vm967_vm1 = vcmp.eq.s32.totalorder %v2163_v47, %v2169_v51 }
 0x1e0   :  { %vm977_vm6 = vcmp.eq.s32.totalorder %v2163_v47, %v2184_v23  ;;  %v2206_v55 = vadd.s32 120, %v2161_v41  ;;  %v2236_v23 = vadd.s32 176, %v2161_v41 }
 0x1e1   :  { %v353_v50 = vadd.f32 %v352_v39, %v290_v57  ;;  %3189 = vst [vmem:[#allocation27_spill] sm:$0xff] %v2187_v35  ;;  %vm979_vm7 = vcmp.eq.s32.totalorder %v2163_v47, %v2187_v35  ;;  %v2209_v57 = vadd.s32 128, %v2161_v41  ;;  %v2212_v39 = vadd.s32 128, %v2163_v47 }
 0x1e2   :  { %3190 = vst [vmem:[#allocation28_spill] sm:$0xff] %v2206_v55  ;;  %v2227_v35 = vadd.s32 168, %v2161_v41  ;;  %vm981_vm8 = vcmp.eq.s32.totalorder %v2163_v47, %v2206_v55  ;;  %3198 = vst [vmem:[#allocation36_spill] sm:$0xff] %v2236_v23  ;;  %v2267_v23 = vadd.s32 216, %v2161_v41  ;;  %v2276_v55 = vadd.s32 232, %v2161_v41 }
 0x1e3   :  { %354 = vadd.xlane.f32.xlu0 %v353_v50  ;;  %v2172_v50 = vadd.s32 72, %v2161_v41  ;;  %3191 = vst [vmem:[#allocation29_spill] sm:$0xff] %v2209_v57  ;;  %3192 = vst [vmem:[#allocation30_spill] sm:$0xff] %v2212_v39  ;;  %vm984_vm9 = vcmp.eq.s32.totalorder %v2212_v39, %v2209_v57  ;;  %v2252_v57 = vadd.s32 192, %v2161_v41 }
 0x1e4   :  { %3197 = vst [vmem:[#allocation35_spill] sm:$0xff] %v2227_v35  ;;  %v2264_v35 = vadd.s32 200, %v2161_v41  ;;  %3205 = vst [vmem:[#allocation43_spill] sm:$0xff] %v2267_v23 }
 0x1e5   :  { %vm969_vm2 = vcmp.eq.s32.totalorder %v2163_v47, %v2172_v50  ;;  %3200 = vst [vmem:[#allocation38_spill] sm:$0xff] %v2252_v57  ;;  %3206 = vst [vmem:[#allocation44_spill] sm:$0xff] %v2276_v55 }
 0x1e6   :  { %3204 = vst [vmem:[#allocation42_spill] sm:$0xff] %v2264_v35  ;;  %vm1002_vm10 = vcmp.eq.s32.totalorder %v2212_v39, %v2264_v35  ;;  %v917_v35 = vadd.s32 8, %v2161_v41 }
 0x1e8   :  { %vm953_vm14 = vcmp.eq.s32.totalorder %v2163_v47, %v917_v35 }
 0x270   :  { %v355_v19 = vpop.xlane.xlu0 %354 }
 0x271   :  { %v356_v59 = vrot.slane %v355_v19, 4 }
 0x273   :  { %v357_v43 = vadd.f32 %v356_v59, %v355_v19  ;;  %v2175_v19 = vadd.s32 80, %v2161_v41  ;;  %v2215_v59 = vadd.s32 136, %v2161_v41 }
 0x275   :  { %v358_v56 = vrot.slane %v357_v43, 2  ;;  %vm971_vm3 = vcmp.eq.s32.totalorder %v2163_v47, %v2175_v19  ;;  %3193 = vst [vmem:[#allocation31_spill] sm:$0xff] %v2215_v59  ;;  %v2249_v59 = vadd.s32 184, %v2161_v41 }
 0x277   :  { %v359_v5 = vadd.f32 %v358_v56, %v357_v43  ;;  %v2178_v56 = vadd.s32 88, %v2161_v41  ;;  %v2218_v43 = vadd.s32 144, %v2161_v41  ;;  %3199 = vst [vmem:[#allocation37_spill] sm:$0xff] %v2249_v59 }
 0x279   :  { %v360_v53 = vrot.slane %v359_v5, 1  ;;  %vm973_vm4 = vcmp.eq.s32.totalorder %v2163_v47, %v2178_v56  ;;  %3194 = vst [vmem:[#allocation32_spill] sm:$0xff] %v2218_v43  ;;  %v2255_v43 = vadd.s32 208, %v2161_v41 }
 0x27b   :  { %v361_v3 = vadd.f32 %v360_v53, %v359_v5  ;;  %v2221_v5 = vadd.s32 152, %v2161_v41  ;;  %v2224_v53 = vadd.s32 160, %v2161_v41  ;;  %3201 = vst [vmem:[#allocation39_spill] sm:$0xff] %v2255_v43  ;;  %v2289_v43 = vadd.s32 248, %v2161_v41 }
 0x27d   :  { %1303 = vpush %v361_v3  ;;  %v2181_v3 = vadd.s32 96, %v2161_v41  ;;  %3195 = vst [vmem:[#allocation33_spill] sm:$0xff] %v2221_v5  ;;  %v2258_v5 = vadd.s32 224, %v2161_v41 }
 0x27e   :  { %3196 = vst [vmem:[#allocation34_spill] sm:$0xff] %v2224_v53  ;;  %v2261_v53 = vadd.s32 240, %v2161_v41  ;;  %3207 = vst [vmem:[#allocation45_spill] sm:$0xff] %v2289_v43  ;;  %v918_v43 = vadd.s32 16, %v2161_v41 }
 0x27f   :  { %3187 = vst [vmem:[#allocation25_spill] sm:$0xff] %v2181_v3  ;;  %vm975_vm5 = vcmp.eq.s32.totalorder %v2163_v47, %v2181_v3  ;;  %3202 = vst [vmem:[#allocation40_spill] sm:$0xff] %v2258_v5  ;;  %vm1008_vm12 = vcmp.eq.s32.totalorder %v2212_v39, %v2258_v5 }
 0x280   :  { %3203 = vst [vmem:[#allocation41_spill] sm:$0xff] %v2261_v53  ;;  %vm1012_vm11 = vcmp.eq.s32.totalorder %v2212_v39, %v2261_v53  ;;  %vm955_vm13 = vcmp.eq.s32.totalorder %v2163_v47, %v918_v43 }
 0x2ae   :  { %s1304_s21 = spop %1303 }
 0x2af   :  { %s365_s22 = smul.f32 1.5259022e-05, %s1304_s21 }
 0x2b1   :  { %s366_s24 = smax.f32 %s1559_s23, %s365_s22 }
 0x2b2   :  { %v367_v53 = vstv %s366_s24 }
 0x2b3   :  { %1314 = vrsqrt.f32 %v367_v53 }
 0x2bd   :  { %v1315_v5 = vpop.eup %1314 }
 0x2be   :  { %1305 = vpush %v1315_v5 }
 0x2ef   :  { %s1306_s25 = spop %1305 }
 0x2f0   :  { %v2294_v23 = vstv %s1306_s25 }
 0x2f1   :  { %v2302_v55 = vmul.f32 %v2294_v23, %v1787_v25  ;;  %v2306_v53 = vmul.f32 %v2294_v23, %v1779_v61  ;;  %v2310_v5 = vmul.f32 %v2294_v23, %v1783_v13  ;;  %v2316_v59 = vmul.f32 %v2294_v23, %v1799_v0 }
 0x2f2   :  { %v919_v25 = vadd.s32 24, %v2161_v41  ;;  %v2324_v13 = vmul.f32 %v2294_v23, %v1795_v17  ;;  %v2329_v3 = vmul.f32 %v2294_v23, %v1811_v4  ;;  %v920_v0 = vadd.s32 32, %v2161_v41 }
 0x2f3   :  { %v1017_v57 = vsel %vm953_vm14, %v2302_v55, 0.0  ;;  %v1015_v35 = vsel %vm951_vm15, %v2306_v53, 0.0  ;;  %v435_v61 = vmax.f32 %v2306_v53, %v2310_v5  ;;  %v1019_v39 = vsel %vm955_vm13, %v2316_v59, 0.0 }
 0x2f4   :  { %1083 = vadd.xlane.f32.xlu0 %v1017_v57  ;;  %1080 = vadd.xlane.f32.xlu1 %v1015_v35  ;;  %vm957_vm14 = vcmp.eq.s32.totalorder %v2163_v47, %v919_v25  ;;  %v438_v57 = vmax.f32 %v2302_v55, %v2324_v13  ;;  %v2337_v43 = vmul.f32 %v2294_v23, %v1817_v45  ;;  %v921_v4 = vadd.s32 40, %v2161_v41 }
 0x2f5   :  { %v1021_v17 = vsel %vm957_vm14, %v2329_v3, 0.0  ;;  %v2342_v35 = vmul.f32 %v2294_v23, %v1823_v63  ;;  %vm959_vm13 = vcmp.eq.s32.totalorder %v2163_v47, %v920_v0  ;;  %v2350_v25 = vmul.f32 %v2294_v23, %v1835_v29 }
 0x2f6   :  { %v2354_v45 = vmul.f32 %v2294_v23, %v1841_v37  ;;  %vm961_vm15 = vcmp.eq.s32.totalorder %v2163_v47, %v921_v4  ;;  %v2367_v29 = vmul.f32 %v2294_v23, %v1865_v6  ;;  %v2383_v6 = vmul.f32 %v2294_v23, %v1883_v12 }
 0x2f7   :  { %v1023_v63 = vsel %vm959_vm13, %v2342_v35, 0.0  ;;  %v1025_v37 = vsel %vm961_vm15, %v2350_v25, 0.0  ;;  %v2387_v4 = vmul.f32 %v2294_v23, %v1889_v14  ;;  %v2400_v12 = vmul.f32 %v2294_v23, %v1907_v20 }
 0x2f8   :  { %1086 = vadd.xlane.f32.xlu0 %v1019_v39  ;;  %436 = vmax.xlane.f32.xlu1 %v435_v61  ;;  %v444_v39 = vmax.f32 %v2329_v3, %v2337_v43  ;;  %v922_v61 = vadd.s32 48, %v2161_v41  ;;  %v450_v0 = vmax.f32 %v2350_v25, %v2354_v45  ;;  %v2377_v41 = vmul.f32 %v2294_v23, %v1805_v2 }
 0x2f9   :  { %v462_v2 = vmax.f32 %v2383_v6, %v2387_v4  ;;  %v2404_v14 = vmul.f32 %v2294_v23, %v1913_v22  ;;  %v2416_v20 = vmul.f32 %v2294_v23, %v1931_v28  ;;  %v2420_v22 = vmul.f32 %v2294_v23, %v1937_v30 }
 0x2fa   :  { %vm963_vm14 = vcmp.eq.s32.totalorder %v2163_v47, %v922_v61  ;;  %v2408_v61 = vmul.f32 %v2294_v23, %v1853_v1  ;;  %v2424_v1 = vmul.f32 %v2294_v23, %v1871_v8  ;;  %v2436_v30 = vmul.f32 %v2294_v23, %v1955_v36  ;;  %v3249_v47 = vld [vmem:[#allocation30_spill] sm:$0xff] }
 0x2fb   :  { %v474_v28 = vmax.f32 %v2416_v20, %v2420_v22  ;;  %v2452_v36 = vmul.f32 %v2294_v23, %v1901_v18  ;;  %v1037_v49 = vsel %vm973_vm4, %v2400_v12, 0.0  ;;  %vm1284_vm13 = vcmask 0  }
 0x2fc   :  { %1089 = vadd.xlane.f32.xlu0 %v1021_v17  ;;  %439 = vmax.xlane.f32.xlu1 %v438_v57  ;;  %v2363_v57 = vmul.f32 %v2294_v23, %v1859_v21  ;;  %v2372_v17 = vmul.f32 %v2294_v23, %v1847_v9 }
 0x2fe   :  { %v456_v21 = vmax.f32 %v2363_v57, %v2367_v29  ;;  %v1027_v9 = vsel %vm963_vm14, %v2372_v17, 0.0 }
 0x300   :  { %1092 = vadd.xlane.f32.xlu0 %v1023_v63  ;;  %445 = vmax.xlane.f32.xlu1 %v444_v39  ;;  %v441_v39 = vmax.f32 %v2316_v59, %v2377_v41  ;;  %v2396_v63 = vmul.f32 %v2294_v23, %v1829_v33  ;;  %v468_v33 = vmax.f32 %v2400_v12, %v2404_v14 }
 0x304   :  { %1095 = vadd.xlane.f32.xlu0 %v1025_v37  ;;  %451 = vmax.xlane.f32.xlu1 %v450_v0  ;;  %v447_v0 = vmax.f32 %v2342_v35, %v2396_v63  ;;  %v2428_v37 = vmul.f32 %v2294_v23, %v1877_v10  ;;  %v2446_v10 = vmul.f32 %v2294_v23, %v1895_v16 }
 0x305   :  { %v2464_v16 = vmul.f32 %v2294_v23, %v1919_v24 }
 0x306   :  { %v459_v8 = vmax.f32 %v2424_v1, %v2428_v37  ;;  %v465_v18 = vmax.f32 %v2446_v10, %v2452_v36 }
 0x308   :  { %1098 = vadd.xlane.f32.xlu0 %v1027_v9  ;;  %457 = vmax.xlane.f32.xlu1 %v456_v21  ;;  %v453_v21 = vmax.f32 %v2372_v17, %v2408_v61  ;;  %v2440_v9 = vmul.f32 %v2294_v23, %v1961_v38  ;;  %v2456_v38 = vmul.f32 %v2294_v23, %v1979_v44 }
 0x30c   :  { %442 = vmax.xlane.f32.xlu0 %v441_v39  ;;  %463 = vmax.xlane.f32.xlu1 %v462_v2  ;;  %v480_v39 = vmax.f32 %v2436_v30, %v2440_v9  ;;  %v2460_v2 = vmul.f32 %v2294_v23, %v1985_v46  ;;  %v2476_v46 = vmul.f32 %v2294_v23, %v2003_v52 }
 0x30d   :  { %v2492_v52 = vmul.f32 %v2294_v23, %v1949_v34 }
 0x30e   :  { %v486_v44 = vmax.f32 %v2456_v38, %v2460_v2 }
 0x310   :  { %448 = vmax.xlane.f32.xlu0 %v447_v0  ;;  %469 = vmax.xlane.f32.xlu1 %v468_v33  ;;  %v2468_v0 = vmul.f32 %v2294_v23, %v1925_v26  ;;  %v2480_v33 = vmul.f32 %v2294_v23, %v2009_v54  ;;  %v2486_v26 = vmul.f32 %v2294_v23, %v1943_v32 }
 0x311   :  { %v2496_v54 = vmul.f32 %v2294_v23, %v2027_v60  ;;  %v2504_v32 = vmul.f32 %v2294_v23, %v1967_v40  ;;  %v2524_v40 = vmul.f32 %v2294_v23, %v1991_v48 }
 0x312   :  { %v471_v24 = vmax.f32 %v2464_v16, %v2468_v0  ;;  %v477_v34 = vmax.f32 %v2486_v26, %v2492_v52 }
 0x313   :  { %3208 = vst [vmem:[#allocation46_spill] sm:$0xff] %v2496_v54 }
 0x314   :  { %454 = vmax.xlane.f32.xlu0 %v453_v21  ;;  %475 = vmax.xlane.f32.xlu1 %v474_v28  ;;  %v492_v21 = vmax.f32 %v2476_v46, %v2480_v33  ;;  %v2500_v28 = vmul.f32 %v2294_v23, %v2033_v62  ;;  %v2516_v62 = vmul.f32 %v2294_v23, %v2051_v11 }
 0x316   :  { %3209 = vst [vmem:[#allocation47_spill] sm:$0xff] %v2500_v28  ;;  %v498_v60 = vmax.f32 %v2496_v54, %v2500_v28  ;;  %3210 = vst [vmem:[#allocation48_spill] sm:$0xff] %v2516_v62  ;;  %v3219_v28 = vld [vmem:[#allocation14_spill] sm:$0xff]  ;;  %v3223_v54 = vld [vmem:[#allocation24_spill] sm:$0xff] }
 0x318   :  { %460 = vmax.xlane.f32.xlu0 %v459_v8  ;;  %481 = vmax.xlane.f32.xlu1 %v480_v39  ;;  %v2508_v8 = vmul.f32 %v2294_v23, %v1973_v42  ;;  %v2520_v39 = vmul.f32 %v2294_v23, %v2057_v15  ;;  %v3212_v42 = vld [vmem:[#allocation20_spill] sm:$0xff] }
 0x31a   :  { %3211 = vst [vmem:[#allocation49_spill] sm:$0xff] %v2520_v39  ;;  %v504_v11 = vmax.f32 %v2516_v62, %v2520_v39  ;;  %v3218_v62 = vld [vmem:[#allocation22_spill] sm:$0xff] }
 0x31c   :  { %466 = vmax.xlane.f32.xlu0 %v465_v18  ;;  %487 = vmax.xlane.f32.xlu1 %v486_v44  ;;  %v2528_v18 = vmul.f32 %v2294_v23, %v3212_v42  ;;  %v483_v44 = vmax.f32 %v2504_v32, %v2508_v8 }
 0x31e   :  { %v489_v48 = vmax.f32 %v2524_v40, %v2528_v18 }
 0x320   :  { %472 = vmax.xlane.f32.xlu0 %v471_v24  ;;  %493 = vmax.xlane.f32.xlu1 %v492_v21  ;;  %v3213_v24 = vld [vmem:[#allocation10_spill] sm:$0xff]  ;;  %v3215_v21 = vld [vmem:[#allocation11_spill] sm:$0xff] }
 0x321   :  { %v2536_v15 = vmul.f32 %v2294_v23, %v3213_v24  ;;  %v2552_v24 = vmul.f32 %v2294_v23, %v3218_v62 }
 0x323   :  { %3214 = vst [vmem:[#allocation20_spill] sm:$0xff] %v2536_v15 }
 0x324   :  { %478 = vmax.xlane.f32.xlu0 %v477_v34  ;;  %499 = vmax.xlane.f32.xlu1 %v498_v60  ;;  %v2540_v34 = vmul.f32 %v2294_v23, %v3215_v21  ;;  %v3217_v60 = vld [vmem:[#allocation21_spill] sm:$0xff]  ;;  %v2556_v21 = vmul.f32 %v2294_v23, %v3219_v28 }
 0x325   :  { %v2546_v42 = vmul.f32 %v2294_v23, %v3217_v60 }
 0x326   :  { %3216 = vst [vmem:[#allocation10_spill] sm:$0xff] %v2540_v34  ;;  %v510_v39 = vmax.f32 %v2536_v15, %v2540_v34  ;;  %3220 = vst [vmem:[#allocation11_spill] sm:$0xff] %v2556_v21  ;;  %v2568_v34 = vmul.f32 %v2294_v23, %v3223_v54  ;;  %v2584_v54 = vmul.f32 %v2294_v23, %v2153_v31 }
 0x327   :  { %v495_v62 = vmax.f32 %v2546_v42, %v2552_v24 }
 0x328   :  { %484 = vmax.xlane.f32.xlu0 %v483_v44  ;;  %505 = vmax.xlane.f32.xlu1 %v504_v11  ;;  %v2560_v44 = vmul.f32 %v2294_v23, %v2105_v7  ;;  %v3222_v11 = vld [vmem:[#allocation23_spill] sm:$0xff]  ;;  %3224 = vst [vmem:[#allocation22_spill] sm:$0xff] %v2568_v34  ;;  %v2576_v7 = vmul.f32 %v2294_v23, %v2123_v58  ;;  %3228 = vst [vmem:[#allocation24_spill] sm:$0xff] %v2584_v54 }
 0x329   :  { %v2564_v60 = vmul.f32 %v2294_v23, %v3222_v11  ;;  %v3229_v11 = vld [vmem:[#allocation8_spill] sm:$0xff] }
 0x32a   :  { %3221 = vst [vmem:[#allocation21_spill] sm:$0xff] %v2560_v44  ;;  %v516_v28 = vmax.f32 %v2556_v21, %v2560_v44  ;;  %3225 = vst [vmem:[#allocation14_spill] sm:$0xff] %v2576_v7  ;;  %v2588_v15 = vmul.f32 %v2294_v23, %v3229_v11  ;;  %v3230_v21 = vld [vmem:[#allocation9_spill] sm:$0xff]  ;;  %v3232_v11 = vld [vmem:[#allocation12_spill] sm:$0xff] }
 0x32b   :  { %v501_v44 = vmax.f32 %v2564_v60, %v2568_v34  ;;  %v2608_v34 = vmul.f32 %v2294_v23, %v3232_v11 }
 0x32c   :  { %490 = vmax.xlane.f32.xlu0 %v489_v48  ;;  %511 = vmax.xlane.f32.xlu1 %v510_v39  ;;  %v3226_v48 = vld [vmem:[#allocation17_spill] sm:$0xff] }
 0x32d   :  { %v2580_v39 = vmul.f32 %v2294_v23, %v3226_v48  ;;  %v2596_v48 = vmul.f32 %v2294_v23, %v3230_v21 }
 0x32f   :  { %3227 = vst [vmem:[#allocation23_spill] sm:$0xff] %v2580_v39  ;;  %v522_v58 = vmax.f32 %v2576_v7, %v2580_v39  ;;  %v507_v31 = vmax.f32 %v2588_v15, %v2596_v48  ;;  %v3233_v39 = vld [vmem:[#allocation13_spill] sm:$0xff]  ;;  %v3235_v7 = vld [vmem:[#allocation16_spill] sm:$0xff] }
 0x330   :  { %496 = vmax.xlane.f32.xlu0 %v495_v62  ;;  %517 = vmax.xlane.f32.xlu1 %v516_v28  ;;  %v2600_v62 = vmul.f32 %v2294_v23, %v2147_v27  ;;  %v2612_v21 = vmul.f32 %v2294_v23, %v3233_v39 }
 0x332   :  { %3231 = vst [vmem:[#allocation17_spill] sm:$0xff] %v2600_v62  ;;  %v528_v28 = vmax.f32 %v2600_v62, %v2584_v54  ;;  %v513_v27 = vmax.f32 %v2608_v34, %v2612_v21  ;;  %v2622_v54 = vmul.f32 %v2294_v23, %v3235_v7  ;;  %v3236_v62 = vld [vmem:[#allocation18_spill] sm:$0xff]  ;;  %v1029_v7 = vsel %vm965_vm0, %v2363_v57, 0.0 }
 0x333   :  { %v2628_v39 = vmul.f32 %v2294_v23, %v3236_v62  ;;  %v1031_v62 = vsel %vm967_vm1, %v2424_v1, 0.0 }
 0x334   :  { %502 = vmax.xlane.f32.xlu0 %v501_v44  ;;  %523 = vmax.xlane.f32.xlu1 %v522_v58  ;;  %v3234_v44 = vld [vmem:[#allocation15_spill] sm:$0xff] }
 0x335   :  { %v2618_v58 = vmul.f32 %v2294_v23, %v3234_v44 }
 0x337   :  { %v519_v11 = vmax.f32 %v2618_v58, %v2622_v54 }
 0x338   :  { %508 = vmax.xlane.f32.xlu0 %v507_v31  ;;  %529 = vmax.xlane.f32.xlu1 %v528_v28  ;;  %v3237_v31 = vld [vmem:[#allocation19_spill] sm:$0xff] }
 0x339   :  { %v2632_v28 = vmul.f32 %v2294_v23, %v3237_v31  ;;  %v1033_v23 = vsel %vm969_vm2, %v2383_v6, 0.0 }
 0x33b   :  { %v525_v44 = vmax.f32 %v2628_v39, %v2632_v28 }
 0x33c   :  { %514 = vmax.xlane.f32.xlu0 %v513_v27  ;;  %v1035_v27 = vsel %vm971_vm3, %v2446_v10, 0.0 }
 0x340   :  { %520 = vmax.xlane.f32.xlu0 %v519_v11  ;;  %v1039_v11 = vsel %vm975_vm5, %v2464_v16, 0.0 }
 0x344   :  { %526 = vmax.xlane.f32.xlu0 %v525_v44 }
 0x348   :  { %1101 = vadd.xlane.f32.xlu0 %v1029_v7 }
 0x34c   :  { %1104 = vadd.xlane.f32.xlu0 %v1031_v62 }
 0x350   :  { %1107 = vadd.xlane.f32.xlu0 %v1033_v23 }
 0x354   :  { %1110 = vadd.xlane.f32.xlu0 %v1035_v27 }
 0x358   :  { %1113 = vadd.xlane.f32.xlu0 %v1037_v49 }
 0x35c   :  { %1116 = vadd.xlane.f32.xlu0 %v1039_v11 }
 0x381   :  { %v2660_v50 = vpop.xlane.xlu0 %1083  ;;  %v2662_v31 = vpop.xlane.xlu1 %1080 }
 0x382   :  { %3239 = vst [vmem:[#allocation8_spill] sm:$0xff] %v2660_v50  ;;  %3240 = vst [vmem:[#allocation9_spill] sm:$0xff] %v2662_v31 }
 0x385   :  { %v2664_v44 = vpop.xlane.xlu0 %1086  ;;  %v2666_v19 = vpop.xlane.xlu1 %436 }
 0x386   :  { %3241 = vst [vmem:[#allocation12_spill] sm:$0xff] %v2664_v44  ;;  %v531_v7 = vsub.f32 %v2306_v53, %v2666_v19  ;;  %v532_v56 = vsub.f32 %v2310_v5, %v2666_v19 }
 0x388   :  { %v595_v62 = vmul.f32 1.442695, %v531_v7  ;;  %v597_v23 = vmul.f32 1.442695, %v532_v56 }
 0x389   :  { %v2672_v27 = vpop.xlane.xlu0 %1089  ;;  %v2674_v49 = vpop.xlane.xlu1 %439 }
 0x38a   :  { %1316 = vpow2.f32 %v595_v62  ;;  %v533_v51 = vsub.f32 %v2302_v55, %v2674_v49  ;;  %v534_v11 = vsub.f32 %v2324_v13, %v2674_v49 }
 0x38b   :  { %1318 = vpow2.f32 %v597_v23 }
 0x38c   :  { %v599_v44 = vmul.f32 1.442695, %v533_v51  ;;  %v601_v31 = vmul.f32 1.442695, %v534_v11 }
 0x38d   :  { %v2680_v53 = vpop.xlane.xlu0 %1092  ;;  %v2682_v50 = vpop.xlane.xlu1 %445 }
 0x38e   :  { %3242 = vst [vmem:[#allocation13_spill] sm:$0xff] %v2680_v53  ;;  %1320 = vpow2.f32 %v599_v44  ;;  %v537_v5 = vsub.f32 %v2329_v3, %v2682_v50  ;;  %v538_v7 = vsub.f32 %v2337_v43, %v2682_v50 }
 0x38f   :  { %1322 = vpow2.f32 %v601_v31 }
 0x390   :  { %v607_v56 = vmul.f32 1.442695, %v537_v5  ;;  %v609_v55 = vmul.f32 1.442695, %v538_v7 }
 0x391   :  { %v2688_v62 = vpop.xlane.xlu0 %1095  ;;  %v2690_v13 = vpop.xlane.xlu1 %451 }
 0x392   :  { %3243 = vst [vmem:[#allocation15_spill] sm:$0xff] %v2688_v62  ;;  %1324 = vpow2.f32 %v607_v56  ;;  %v541_v23 = vsub.f32 %v2350_v25, %v2690_v13  ;;  %v542_v44 = vsub.f32 %v2354_v45, %v2690_v13 }
 0x393   :  { %1326 = vpow2.f32 %v609_v55 }
 0x394   :  { %v1317_v51 = vpop.eup %1316  ;;  %v615_v3 = vmul.f32 1.442695, %v541_v23  ;;  %v617_v11 = vmul.f32 1.442695, %v542_v44 }
 0x395   :  { %v1319_v53 = vpop.eup %1318  ;;  %v2696_v43 = vpop.xlane.xlu0 %1098 }
 0x396   :  { %3244 = vst [vmem:[#allocation16_spill] sm:$0xff] %v2696_v43  ;;  %v2698_v31 = vpop.xlane.xlu1 %457  ;;  %1328 = vpow2.f32 %v615_v3  ;;  %v723_v25 = vadd.f32 %v1319_v53, %v1317_v51 }
 0x397   :  { %3245 = vst [vmem:[#allocation18_spill] sm:$0xff] %v2698_v31  ;;  %v545_v5 = vsub.f32 %v2363_v57, %v2698_v31  ;;  %v546_v7 = vsub.f32 %v2367_v29, %v2698_v31  ;;  %1330 = vpow2.f32 %v617_v11 }
 0x398   :  { %v1321_v56 = vpop.eup %1320  ;;  %724 = vadd.xlane.f32.xlu0 %v723_v25 }
 0x399   :  { %v623_v45 = vmul.f32 1.442695, %v545_v5  ;;  %v625_v55 = vmul.f32 1.442695, %v546_v7  ;;  %v1323_v23 = vpop.eup %1322  ;;  %v2704_v44 = vpop.xlane.xlu0 %442 }
 0x39a   :  { %v2706_v62 = vpop.xlane.xlu1 %463  ;;  %v535_v3 = vsub.f32 %v2316_v59, %v2704_v44  ;;  %v536_v57 = vsub.f32 %v2377_v41, %v2704_v44  ;;  %v726_v51 = vadd.f32 %v1323_v23, %v1321_v56 }
 0x39b   :  { %1332 = vpow2.f32 %v623_v45  ;;  %v549_v29 = vsub.f32 %v2383_v6, %v2706_v62  ;;  %v550_v53 = vsub.f32 %v2387_v4, %v2706_v62 }
 0x39c   :  { %1334 = vpow2.f32 %v625_v55  ;;  %v1325_v11 = vpop.eup %1324  ;;  %v603_v5 = vmul.f32 1.442695, %v535_v3  ;;  %v605_v7 = vmul.f32 1.442695, %v536_v57  ;;  %727 = vadd.xlane.f32.xlu1 %v726_v51 }
 0x39d   :  { %v631_v25 = vmul.f32 1.442695, %v549_v29  ;;  %v1327_v31 = vpop.eup %1326  ;;  %v633_v45 = vmul.f32 1.442695, %v550_v53  ;;  %v2716_v43 = vpop.xlane.xlu0 %448 }
 0x39e   :  { %1336 = vpow2.f32 %v603_v5  ;;  %v539_v59 = vsub.f32 %v2342_v35, %v2716_v43  ;;  %v540_v41 = vsub.f32 %v2396_v63, %v2716_v43  ;;  %v732_v6 = vadd.f32 %v1327_v31, %v1325_v11  ;;  %v2730_v5 = vpop.xlane.xlu1 %469 }
 0x39f   :  { %1338 = vpow2.f32 %v605_v7 }
 0x3a0   :  { %v1329_v4 = vpop.eup %1328  ;;  %1340 = vpow2.f32 %v631_v25  ;;  %v611_v56 = vmul.f32 1.442695, %v539_v59  ;;  %v613_v55 = vmul.f32 1.442695, %v540_v41  ;;  %733 = vadd.xlane.f32.xlu1 %v732_v6  ;;  %v553_v6 = vsub.f32 %v2400_v12, %v2730_v5 }
 0x3a1   :  { %v1331_v23 = vpop.eup %1330  ;;  %1342 = vpow2.f32 %v633_v45  ;;  %v2722_v3 = vpop.xlane.xlu0 %454 }
 0x3a2   :  { %1344 = vpow2.f32 %v611_v56  ;;  %v543_v57 = vsub.f32 %v2372_v17, %v2722_v3  ;;  %v544_v35 = vsub.f32 %v2408_v61, %v2722_v3  ;;  %v738_v63 = vadd.f32 %v1331_v23, %v1329_v4 }
 0x3a3   :  { %1346 = vpow2.f32 %v613_v55  ;;  %v554_v55 = vsub.f32 %v2404_v14, %v2730_v5 }
 0x3a4   :  { %v619_v31 = vmul.f32 1.442695, %v543_v57  ;;  %v621_v53 = vmul.f32 1.442695, %v544_v35  ;;  %739 = vadd.xlane.f32.xlu1 %v738_v63 }
 0x3a5   :  { %v1333_v29 = vpop.eup %1332  ;;  %v2728_v11 = vpop.xlane.xlu0 %460  ;;  %v641_v14 = vmul.f32 1.442695, %v554_v55 }
 0x3a6   :  { %v1335_v51 = vpop.eup %1334  ;;  %1348 = vpow2.f32 %v619_v31  ;;  %v547_v7 = vsub.f32 %v2424_v1, %v2728_v11  ;;  %v548_v17 = vsub.f32 %v2428_v37, %v2728_v11  ;;  %v639_v31 = vmul.f32 1.442695, %v553_v6 }
 0x3a7   :  { %1350 = vpow2.f32 %v621_v53  ;;  %v744_v61 = vadd.f32 %v1335_v51, %v1333_v29 }
 0x3a8   :  { %v1337_v25 = vpop.eup %1336  ;;  %v627_v45 = vmul.f32 1.442695, %v547_v7  ;;  %v629_v59 = vmul.f32 1.442695, %v548_v17  ;;  %v2748_v7 = vpop.xlane.xlu1 %475 }
 0x3a9   :  { %v1339_v41 = vpop.eup %1338  ;;  %745 = vadd.xlane.f32.xlu1 %v744_v61  ;;  %v2738_v4 = vpop.xlane.xlu0 %466 }
 0x3aa   :  { %v1341_v56 = vpop.eup %1340  ;;  %1352 = vpow2.f32 %v627_v45  ;;  %v551_v1 = vsub.f32 %v2446_v10, %v2738_v4  ;;  %v552_v37 = vsub.f32 %v2452_v36, %v2738_v4  ;;  %v729_v57 = vadd.f32 %v1339_v41, %v1337_v25 }
 0x3ab   :  { %v1343_v23 = vpop.eup %1342  ;;  %1354 = vpow2.f32 %v629_v59  ;;  %v557_v45 = vsub.f32 %v2416_v20, %v2748_v7  ;;  %v558_v41 = vsub.f32 %v2420_v22, %v2748_v7 }
 0x3ac   :  { %v1345_v35 = vpop.eup %1344  ;;  %v635_v63 = vmul.f32 1.442695, %v551_v1  ;;  %v637_v12 = vmul.f32 1.442695, %v552_v37  ;;  %730 = vadd.xlane.f32.xlu0 %v729_v57  ;;  %v750_v53 = vadd.f32 %v1343_v23, %v1341_v56  ;;  %v2762_v57 = vpop.xlane.xlu1 %481 }
 0x3ad   :  { %v1347_v29 = vpop.eup %1346  ;;  %v2746_v51 = vpop.xlane.xlu0 %472  ;;  %v647_v1 = vmul.f32 1.442695, %v557_v45  ;;  %v649_v23 = vmul.f32 1.442695, %v558_v41 }
 0x3ae   :  { %1356 = vpow2.f32 %v635_v63  ;;  %v555_v10 = vsub.f32 %v2464_v16, %v2746_v51  ;;  %v556_v36 = vsub.f32 %v2468_v0, %v2746_v51  ;;  %751 = vadd.xlane.f32.xlu1 %v750_v53  ;;  %v735_v17 = vadd.f32 %v1347_v29, %v1345_v35 }
 0x3af   :  { %1358 = vpow2.f32 %v637_v12  ;;  %v561_v29 = vsub.f32 %v2436_v30, %v2762_v57  ;;  %v562_v53 = vsub.f32 %v2440_v9, %v2762_v57 }
 0x3b0   :  { %v1349_v61 = vpop.eup %1348  ;;  %1360 = vpow2.f32 %v639_v31  ;;  %v643_v59 = vmul.f32 1.442695, %v555_v10  ;;  %736 = vadd.xlane.f32.xlu0 %v735_v17  ;;  %v645_v6 = vmul.f32 1.442695, %v556_v36  ;;  %v2778_v9 = vpop.xlane.xlu1 %487 }
 0x3b1   :  { %v1351_v25 = vpop.eup %1350  ;;  %1362 = vpow2.f32 %v641_v14  ;;  %v2758_v16 = vpop.xlane.xlu0 %478  ;;  %v655_v45 = vmul.f32 1.442695, %v561_v29  ;;  %v657_v41 = vmul.f32 1.442695, %v562_v53 }
 0x3b2   :  { %v741_v56 = vadd.f32 %v1351_v25, %v1349_v61  ;;  %1364 = vpow2.f32 %v643_v59  ;;  %v559_v37 = vsub.f32 %v2486_v26, %v2758_v16  ;;  %v560_v35 = vsub.f32 %v2492_v52, %v2758_v16 }
 0x3b3   :  { %1366 = vpow2.f32 %v645_v6  ;;  %v1041_v25 = vsel %vm977_vm6, %v2416_v20, 0.0 }
 0x3b4   :  { %v1353_v0 = vpop.eup %1352  ;;  %742 = vadd.xlane.f32.xlu0 %v741_v56  ;;  %1368 = vpow2.f32 %v647_v1  ;;  %v651_v31 = vmul.f32 1.442695, %v559_v37  ;;  %v653_v14 = vmul.f32 1.442695, %v560_v35  ;;  %v1043_v1 = vsel %vm979_vm7, %v2486_v26, 0.0 }
 0x3b5   :  { %v1355_v55 = vpop.eup %1354  ;;  %1370 = vpow2.f32 %v649_v23  ;;  %v2770_v10 = vpop.xlane.xlu0 %484  ;;  %v566_v23 = vsub.f32 %v2460_v2, %v2778_v9 }
 0x3b6   :  { %v747_v22 = vadd.f32 %v1355_v55, %v1353_v0  ;;  %1372 = vpow2.f32 %v651_v31  ;;  %v563_v59 = vsub.f32 %v2504_v32, %v2770_v10  ;;  %v564_v6 = vsub.f32 %v2508_v8, %v2770_v10 }
 0x3b7   :  { %1374 = vpow2.f32 %v653_v14  ;;  %v565_v32 = vsub.f32 %v2456_v38, %v2778_v9  ;;  %v1045_v31 = vsel %vm981_vm8, %v2436_v30, 0.0  ;;  %v665_v14 = vmul.f32 1.442695, %v566_v23 }
 0x3b8   :  { %v1357_v63 = vpop.eup %1356  ;;  %748 = vadd.xlane.f32.xlu0 %v747_v22  ;;  %1376 = vpow2.f32 %v655_v45  ;;  %v659_v37 = vmul.f32 1.442695, %v563_v59  ;;  %v661_v35 = vmul.f32 1.442695, %v564_v6  ;;  %v1048_v45 = vsel %vm984_vm9, %v2508_v8, 0.0  ;;  %v3251_v8 = vld [vmem:[#allocation31_spill] sm:$0xff] }
 0x3b9   :  { %v1359_v12 = vpop.eup %1358  ;;  %1378 = vpow2.f32 %v657_v41  ;;  %v2790_v22 = vpop.xlane.xlu0 %490  ;;  %v663_v53 = vmul.f32 1.442695, %v565_v32  ;;  %vm3252_vm0 = vcmp.eq.s32.totalorder %v3249_v47, %v3251_v8 }
 0x3ba   :  { %v1361_v36 = vpop.eup %1360  ;;  %v753_v17 = vadd.f32 %v1359_v12, %v1357_v63  ;;  %1380 = vpow2.f32 %v659_v37  ;;  %v567_v38 = vsub.f32 %v2524_v40, %v2790_v22 }
 0x3bb   :  { %v1363_v61 = vpop.eup %1362  ;;  %1382 = vpow2.f32 %v661_v35 }
 0x3bc   :  { %1119 = vadd.xlane.f32.xlu0 %v1041_v25  ;;  %754 = vadd.xlane.f32.xlu1 %v753_v17  ;;  %v1365_v56 = vpop.eup %1364  ;;  %v756_v0 = vadd.f32 %v1363_v61, %v1361_v36  ;;  %v2798_v36 = vpop.xlane.xlu1 %493  ;;  %v568_v17 = vsub.f32 %v2528_v18, %v2790_v22  ;;  %1384 = vpow2.f32 %v663_v53  ;;  %v667_v59 = vmul.f32 1.442695, %v567_v38  ;;  %v3256_v38 = vld [vmem:[#allocation47_spill] sm:$0xff] }
 0x3bd   :  { %v1367_v55 = vpop.eup %1366  ;;  %v569_v40 = vsub.f32 %v2476_v46, %v2798_v36  ;;  %1386 = vpow2.f32 %v665_v14  ;;  %v570_v41 = vsub.f32 %v2480_v33, %v2798_v36 }
 0x3be   :  { %v1369_v63 = vpop.eup %1368  ;;  %v759_v12 = vadd.f32 %v1367_v55, %v1365_v56  ;;  %v669_v6 = vmul.f32 1.442695, %v568_v17  ;;  %v2810_v56 = vpop.xlane.xlu0 %496  ;;  %1388 = vpow2.f32 %v667_v59 }
 0x3bf   :  { %v1371_v29 = vpop.eup %1370  ;;  %v671_v32 = vmul.f32 1.442695, %v569_v40  ;;  %v571_v46 = vsub.f32 %v2546_v42, %v2810_v56  ;;  %v673_v37 = vmul.f32 1.442695, %v570_v41  ;;  %v572_v35 = vsub.f32 %v2552_v24, %v2810_v56  ;;  %v3255_v42 = vld [vmem:[#allocation46_spill] sm:$0xff] }
 0x3c0   :  { %1122 = vadd.xlane.f32.xlu0 %v1043_v1  ;;  %757 = vadd.xlane.f32.xlu1 %v756_v0  ;;  %v1373_v61 = vpop.eup %1372  ;;  %v762_v52 = vadd.f32 %v1371_v29, %v1369_v63  ;;  %v1050_v1 = vsel %vm3252_vm0, %v2460_v2, 0.0  ;;  %v2818_v23 = vpop.xlane.xlu1 %499  ;;  %1390 = vpow2.f32 %v669_v6  ;;  %v3253_v2 = vld [vmem:[#allocation32_spill] sm:$0xff] }
 0x3c1   :  { %v1375_v25 = vpop.eup %1374  ;;  %vm3254_vm1 = vcmp.eq.s32.totalorder %v3249_v47, %v3253_v2  ;;  %1392 = vpow2.f32 %v671_v32  ;;  %v675_v53 = vmul.f32 1.442695, %v571_v46  ;;  %v574_v14 = vsub.f32 %v3256_v38, %v2818_v23 }
 0x3c2   :  { %v1377_v0 = vpop.eup %1376  ;;  %v765_v55 = vadd.f32 %v1375_v25, %v1373_v61  ;;  %v1052_v26 = vsel %vm3254_vm1, %v2528_v18, 0.0  ;;  %1394 = vpow2.f32 %v673_v37  ;;  %v677_v17 = vmul.f32 1.442695, %v572_v35  ;;  %v2830_v61 = vpop.xlane.xlu0 %502  ;;  %v3257_v18 = vld [vmem:[#allocation33_spill] sm:$0xff] }
 0x3c3   :  { %v1379_v20 = vpop.eup %1378  ;;  %vm3258_vm2 = vcmp.eq.s32.totalorder %v3249_v47, %v3257_v18  ;;  %1396 = vpow2.f32 %v675_v53  ;;  %v575_v59 = vsub.f32 %v2564_v60, %v2830_v61  ;;  %v681_v41 = vmul.f32 1.442695, %v574_v14  ;;  %v3262_v60 = vld [vmem:[#allocation48_spill] sm:$0xff]  ;;  %v3263_v35 = vld [vmem:[#allocation49_spill] sm:$0xff] }
 0x3c4   :  { %1125 = vadd.xlane.f32.xlu0 %v1045_v31  ;;  %760 = vadd.xlane.f32.xlu1 %v759_v12  ;;  %v1381_v63 = vpop.eup %1380  ;;  %v768_v12 = vadd.f32 %v1379_v20, %v1377_v0  ;;  %v573_v31 = vsub.f32 %v3255_v42, %v2818_v23  ;;  %v2838_v6 = vpop.xlane.xlu1 %505  ;;  %1398 = vpow2.f32 %v677_v17  ;;  %v3259_v0 = vld [vmem:[#allocation22_spill] sm:$0xff] }
 0x3c5   :  { %v1383_v29 = vpop.eup %1382  ;;  %v577_v46 = vsub.f32 %v3262_v60, %v2838_v6  ;;  %v683_v37 = vmul.f32 1.442695, %v575_v59 }
 0x3c6   :  { %v771_v25 = vadd.f32 %v1383_v29, %v1381_v63  ;;  %v679_v40 = vmul.f32 1.442695, %v573_v31  ;;  %v578_v63 = vsub.f32 %v3263_v35, %v2838_v6  ;;  %v2850_v29 = vpop.xlane.xlu0 %508 }
 0x3c7   :  { %v687_v53 = vmul.f32 1.442695, %v577_v46  ;;  %v579_v14 = vsub.f32 %v2588_v15, %v2850_v29  ;;  %v3268_v15 = vld [vmem:[#allocation20_spill] sm:$0xff] }
 0x3c8   :  { %1128 = vadd.xlane.f32.xlu0 %v1048_v45  ;;  %763 = vadd.xlane.f32.xlu1 %v762_v52  ;;  %v1385_v52 = vpop.eup %1384  ;;  %v1054_v45 = vsel %vm3258_vm2, %v2480_v33, 0.0  ;;  %v3260_v33 = vld [vmem:[#allocation34_spill] sm:$0xff]  ;;  %1400 = vpow2.f32 %v679_v40  ;;  %v689_v17 = vmul.f32 1.442695, %v578_v63 }
 0x3c9   :  { %v1387_v30 = vpop.eup %1386  ;;  %vm3261_vm3 = vcmp.eq.s32.totalorder %v3249_v47, %v3260_v33  ;;  %1402 = vpow2.f32 %v681_v41  ;;  %v691_v41 = vmul.f32 1.442695, %v579_v14 }
 0x3ca   :  { %v1389_v20 = vpop.eup %1388  ;;  %v774_v8 = vadd.f32 %v1387_v30, %v1385_v52  ;;  %v1056_v32 = vsel %vm3261_vm3, %v2552_v24, 0.0  ;;  %v3264_v24 = vld [vmem:[#allocation35_spill] sm:$0xff]  ;;  %1404 = vpow2.f32 %v683_v37  ;;  %v2858_v52 = vpop.xlane.xlu1 %511 }
 0x3cb   :  { %vm3265_vm4 = vcmp.eq.s32.totalorder %v3249_v47, %v3264_v24  ;;  %v581_v59 = vsub.f32 %v3268_v15, %v2858_v52 }
 0x3cc   :  { %1131 = vadd.xlane.f32.xlu0 %v1050_v1  ;;  %766 = vadd.xlane.f32.xlu1 %v765_v55  ;;  %v576_v55 = vsub.f32 %v3259_v0, %v2830_v61  ;;  %v1391_v1 = vpop.eup %1390  ;;  %v1058_v31 = vsel %vm3265_vm4, %v3256_v38, 0.0  ;;  %v3266_v38 = vld [vmem:[#allocation36_spill] sm:$0xff] }
 0x3cd   :  { %v1393_v2 = vpop.eup %1392  ;;  %vm3267_vm5 = vcmp.eq.s32.totalorder %v3249_v47, %v3266_v38  ;;  %v695_v37 = vmul.f32 1.442695, %v581_v59 }
 0x3ce   :  { %v1395_v42 = vpop.eup %1394  ;;  %v1060_v40 = vsel %vm3267_vm5, %v3259_v0, 0.0  ;;  %v3270_v0 = vld [vmem:[#allocation37_spill] sm:$0xff] }
 0x3cf   :  { %v1397_v30 = vpop.eup %1396  ;;  %v780_v18 = vadd.f32 %v1395_v42, %v1393_v2  ;;  %vm3271_vm6 = vcmp.eq.s32.totalorder %v3249_v47, %v3270_v0  ;;  %v2878_v2 = vpop.xlane.xlu1 %517 }
 0x3d0   :  { %1134 = vadd.xlane.f32.xlu0 %v1052_v26  ;;  %769 = vadd.xlane.f32.xlu1 %v768_v12  ;;  %v685_v12 = vmul.f32 1.442695, %v576_v55  ;;  %v777_v26 = vadd.f32 %v1391_v1, %v1389_v20  ;;  %v3269_v55 = vld [vmem:[#allocation10_spill] sm:$0xff]  ;;  %v2870_v1 = vpop.xlane.xlu0 %514  ;;  %v1062_v46 = vsel %vm3271_vm6, %v3263_v35, 0.0 }
 0x3d1   :  { %v582_v20 = vsub.f32 %v3269_v55, %v2858_v52  ;;  %v583_v63 = vsub.f32 %v2608_v34, %v2870_v1  ;;  %v3272_v35 = vld [vmem:[#allocation38_spill] sm:$0xff]  ;;  %v3274_v34 = vld [vmem:[#allocation11_spill] sm:$0xff] }
 0x3d2   :  { %1406 = vpow2.f32 %v685_v12  ;;  %vm3273_vm7 = vcmp.eq.s32.totalorder %v3249_v47, %v3272_v35  ;;  %v585_v14 = vsub.f32 %v3274_v34, %v2878_v2 }
 0x3d3   :  { %1408 = vpow2.f32 %v687_v53  ;;  %v697_v12 = vmul.f32 1.442695, %v582_v20  ;;  %v1064_v53 = vsel %vm3273_vm7, %v2596_v48, 0.0 }
 0x3d4   :  { %1137 = vadd.xlane.f32.xlu0 %v1054_v45  ;;  %772 = vadd.xlane.f32.xlu1 %v771_v25  ;;  %v580_v25 = vsub.f32 %v2596_v48, %v2850_v29  ;;  %v1399_v45 = vpop.eup %1398  ;;  %1410 = vpow2.f32 %v689_v17  ;;  %v699_v17 = vmul.f32 1.442695, %v583_v63  ;;  %v3276_v48 = vld [vmem:[#allocation39_spill] sm:$0xff] }
 0x3d5   :  { %v1401_v33 = vpop.eup %1400  ;;  %1412 = vpow2.f32 %v691_v41  ;;  %vm3277_vm8 = vcmp.eq.s32.totalorder %v3249_v47, %v3276_v48  ;;  %v703_v41 = vmul.f32 1.442695, %v585_v14  ;;  %v1076_v14 = vsel %vm1012_vm11, %v2632_v28, 0.0 }
 0x3d6   :  { %v1403_v60 = vpop.eup %1402  ;;  %v1068_v59 = vsel %vm3277_vm8, %v2612_v21, 0.0 }
 0x3d7   :  { %v1405_v42 = vpop.eup %1404  ;;  %v786_v24 = vadd.f32 %v1403_v60, %v1401_v33  ;;  %v2898_v33 = vpop.xlane.xlu1 %523 }
 0x3d8   :  { %1140 = vadd.xlane.f32.xlu0 %v1056_v32  ;;  %775 = vadd.xlane.f32.xlu1 %v774_v8  ;;  %v693_v8 = vmul.f32 1.442695, %v580_v25  ;;  %v783_v32 = vadd.f32 %v1399_v45, %v1397_v30  ;;  %v3275_v25 = vld [vmem:[#allocation21_spill] sm:$0xff]  ;;  %v2890_v45 = vpop.xlane.xlu0 %520  ;;  %3278 = vst [vmem:[#allocation19_spill] sm:$0xff] %v2898_v33 }
 0x3d9   :  { %v586_v30 = vsub.f32 %v3275_v25, %v2878_v2  ;;  %v587_v20 = vsub.f32 %v2618_v58, %v2890_v45  ;;  %v3280_v58 = vld [vmem:[#allocation14_spill] sm:$0xff] }
 0x3da   :  { %1414 = vpow2.f32 %v693_v8  ;;  %v589_v63 = vsub.f32 %v3280_v58, %v2898_v33 }
 0x3db   :  { %1416 = vpow2.f32 %v695_v37  ;;  %v705_v8 = vmul.f32 1.442695, %v586_v30  ;;  %v1072_v37 = vsel %vm1008_vm12, %v2622_v54, 0.0  ;;  %vm1207_vm12 = vcmask 7168  }
 0x3dc   :  { %1143 = vadd.xlane.f32.xlu0 %v1058_v31  ;;  %778 = vadd.xlane.f32.xlu1 %v777_v26  ;;  %v584_v26 = vsub.f32 %v2612_v21, %v2870_v1  ;;  %v1407_v31 = vpop.eup %1406  ;;  %1418 = vpow2.f32 %v697_v12  ;;  %v707_v12 = vmul.f32 1.442695, %v587_v20 }
 0x3dd   :  { %v1409_v38 = vpop.eup %1408  ;;  %1420 = vpow2.f32 %v699_v17  ;;  %v711_v17 = vmul.f32 1.442695, %v589_v63 }
 0x3de   :  { %v1411_v15 = vpop.eup %1410 }
 0x3df   :  { %v1413_v60 = vpop.eup %1412  ;;  %v792_v0 = vadd.f32 %v1411_v15, %v1409_v38  ;;  %v2918_v38 = vpop.xlane.xlu1 %529 }
 0x3e0   :  { %1146 = vadd.xlane.f32.xlu0 %v1060_v40  ;;  %781 = vadd.xlane.f32.xlu1 %v780_v18  ;;  %v701_v18 = vmul.f32 1.442695, %v584_v26  ;;  %v789_v40 = vadd.f32 %v1407_v31, %v1405_v42  ;;  %v3281_v26 = vld [vmem:[#allocation23_spill] sm:$0xff]  ;;  %v2910_v31 = vpop.xlane.xlu0 %526  ;;  %3283 = vst [vmem:[#allocation25_spill] sm:$0xff] %v2918_v38 }
 0x3e1   :  { %v590_v42 = vsub.f32 %v3281_v26, %v2898_v33  ;;  %v591_v30 = vsub.f32 %v2628_v39, %v2910_v31  ;;  %v3285_v39 = vld [vmem:[#allocation24_spill] sm:$0xff] }
 0x3e2   :  { %1422 = vpow2.f32 %v701_v18 }
 0x3e3   :  { %1424 = vpow2.f32 %v703_v41  ;;  %v713_v18 = vmul.f32 1.442695, %v590_v42  ;;  %v3284_v41 = vld [vmem:[#allocation17_spill] sm:$0xff] }
 0x3e4   :  { %1149 = vadd.xlane.f32.xlu0 %v1062_v46  ;;  %784 = vadd.xlane.f32.xlu1 %v783_v32  ;;  %v588_v32 = vsub.f32 %v2622_v54, %v2890_v45  ;;  %v1415_v46 = vpop.eup %1414  ;;  %1426 = vpow2.f32 %v705_v8  ;;  %v593_v20 = vsub.f32 %v3284_v41, %v2918_v38  ;;  %v715_v8 = vmul.f32 1.442695, %v591_v30 }
 0x3e5   :  { %v1417_v35 = vpop.eup %1416  ;;  %1428 = vpow2.f32 %v707_v12 }
 0x3e6   :  { %v1419_v34 = vpop.eup %1418 }
 0x3e7   :  { %v1421_v15 = vpop.eup %1420  ;;  %v798_v48 = vadd.f32 %v1419_v34, %v1417_v35 }
 0x3e8   :  { %1152 = vadd.xlane.f32.xlu0 %v1064_v53  ;;  %787 = vadd.xlane.f32.xlu1 %v786_v24  ;;  %v709_v24 = vmul.f32 1.442695, %v588_v32  ;;  %v795_v53 = vadd.f32 %v1415_v46, %v1413_v60  ;;  %v594_v32 = vsub.f32 %v3285_v39, %v2918_v38 }
 0x3ea   :  { %1430 = vpow2.f32 %v709_v24 }
 0x3eb   :  { %1432 = vpow2.f32 %v711_v17 }
 0x3ec   :  { %1158 = vadd.xlane.f32.xlu0 %v1068_v59  ;;  %790 = vadd.xlane.f32.xlu1 %v789_v40  ;;  %v592_v40 = vsub.f32 %v2632_v28, %v2910_v31  ;;  %v1423_v59 = vpop.eup %1422  ;;  %1434 = vpow2.f32 %v713_v18  ;;  %v721_v28 = vmul.f32 1.442695, %v594_v32 }
 0x3ed   :  { %v801_v46 = vadd.f32 %v1423_v59, %v1421_v15  ;;  %1436 = vpow2.f32 %v715_v8  ;;  %v1066_v15 = vsel %vm1002_vm10, %v3269_v55, 0.0  ;;  %v3287_v59 = vld [vmem:[#allocation43_spill] sm:$0xff]  ;;  %v3291_v55 = vld [vmem:[#allocation45_spill] sm:$0xff] }
 0x3ee   :  { %v717_v60 = vmul.f32 1.442695, %v592_v40  ;;  %vm3288_vm9 = vcmp.eq.s32.totalorder %v3249_v47, %v3287_v59  ;;  %vm3292_vm10 = vcmp.eq.s32.totalorder %v3249_v47, %v3291_v55 }
 0x3ef   :  { %v1070_v41 = vsel %vm3288_vm9, %v3275_v25, 0.0 }
 0x3f0   :  { %1164 = vadd.xlane.f32.xlu0 %v1072_v37  ;;  %793 = vadd.xlane.f32.xlu1 %v792_v0  ;;  %v1425_v0 = vpop.eup %1424  ;;  %v719_v37 = vmul.f32 1.442695, %v593_v20  ;;  %1438 = vpow2.f32 %v717_v60  ;;  %v3289_v20 = vld [vmem:[#allocation44_spill] sm:$0xff]  ;;  %v1078_v60 = vsel %vm3292_vm10, %v3285_v39, 0.0 }
 0x3f1   :  { %v1427_v21 = vpop.eup %1426  ;;  %vm3290_vm11 = vcmp.eq.s32.totalorder %v3249_v47, %v3289_v20 }
 0x3f2   :  { %v1429_v58 = vpop.eup %1428  ;;  %v804_v63 = vadd.f32 %v1427_v21, %v1425_v0  ;;  %1440 = vpow2.f32 %v719_v37  ;;  %v1074_v8 = vsel %vm3290_vm11, %v3281_v26, 0.0 }
 0x3f3   :  { %1442 = vpow2.f32 %v721_v28 }
 0x3f4   :  { %1170 = vadd.xlane.f32.xlu0 %v1076_v14  ;;  %796 = vadd.xlane.f32.xlu1 %v795_v53  ;;  %v1431_v12 = vpop.eup %1430 }
 0x3f5   :  { %v1433_v42 = vpop.eup %1432  ;;  %v807_v24 = vadd.f32 %v1431_v12, %v1429_v58 }
 0x3f6   :  { %v1435_v35 = vpop.eup %1434 }
 0x3f7   :  { %v1437_v53 = vpop.eup %1436  ;;  %v810_v34 = vadd.f32 %v1435_v35, %v1433_v42 }
 0x3f8   :  { %799 = vadd.xlane.f32.xlu1 %v798_v48  ;;  %v2930_v48 = vpop.xlane.xlu0 %1101 }
 0x3fa   :  { %v1439_v54 = vpop.eup %1438 }
 0x3fb   :  { %v813_v17 = vadd.f32 %v1439_v54, %v1437_v53 }
 0x3fc   :  { %802 = vadd.xlane.f32.xlu1 %v801_v46  ;;  %v1441_v14 = vpop.eup %1440  ;;  %v2940_v32 = vpop.xlane.xlu0 %1104 }
 0x3fd   :  { %v1443_v30 = vpop.eup %1442 }
 0x3fe   :  { %v816_v18 = vadd.f32 %v1443_v30, %v1441_v14 }
 0x400   :  { %805 = vadd.xlane.f32.xlu1 %v804_v63  ;;  %v2946_v0 = vpop.xlane.xlu0 %1107 }
 0x404   :  { %808 = vadd.xlane.f32.xlu1 %v807_v24  ;;  %v2948_v46 = vpop.xlane.xlu0 %1110 }
 0x408   :  { %811 = vadd.xlane.f32.xlu1 %v810_v34  ;;  %v2950_v21 = vpop.xlane.xlu0 %1113 }
 0x40c   :  { %814 = vadd.xlane.f32.xlu1 %v813_v17  ;;  %v2952_v28 = vpop.xlane.xlu0 %1116 }
 0x410   :  { %817 = vadd.xlane.f32.xlu1 %v816_v18 }
 0x414   :  { %1155 = vadd.xlane.f32.xlu1 %v1066_v15 }
 0x418   :  { %1161 = vadd.xlane.f32.xlu1 %v1070_v41 }
 0x41c   :  { %1167 = vadd.xlane.f32.xlu1 %v1074_v8 }
 0x420   :  { %1173 = vadd.xlane.f32.xlu1 %v1078_v60 }
 0x425   :  { %v725_v26 = vpop.xlane.xlu0 %724 }
 0x429   :  { %v728_v25 = vpop.xlane.xlu1 %727 }
 0x42a   :  { %1444 = vlog2.f32 %v728_v25 }
 0x42b   :  { %1446 = vlog2.f32 %v725_v26 }
 0x42d   :  { %v734_v37 = vpop.xlane.xlu1 %733 }
 0x431   :  { %v740_v58 = vpop.xlane.xlu1 %739 }
 0x434   :  { %v1445_v54 = vpop.eup %1444 }
 0x435   :  { %v1447_v14 = vpop.eup %1446  ;;  %v822_v40 = vmul.f32 0.6931472, %v1445_v54  ;;  %v3294_v54 = vld [vmem:[#allocation9_spill] sm:$0xff] }
 0x436   :  { %v746_v12 = vpop.xlane.xlu1 %745  ;;  %v820_v15 = vmul.f32 0.6931472, %v1447_v14 }
 0x437   :  { %v884_v20 = vadd.f32 %v822_v40, %v2674_v49 }
 0x438   :  { %v883_v60 = vadd.f32 %v820_v15, %v2666_v19 }
 0x439   :  { %v731_v63 = vpop.xlane.xlu0 %730 }
 0x43a   :  { %1448 = vlog2.f32 %v731_v63  ;;  %v3293_v63 = vld [vmem:[#allocation8_spill] sm:$0xff]  ;;  %v1175_v14 = vsub.f32 %v883_v60, %v3294_v54 }
 0x43b   :  { %v752_v24 = vpop.xlane.xlu1 %751  ;;  %1450 = vlog2.f32 %v734_v37 }
 0x43c   :  { %v1208_v15 = vsel %vm1207_vm12, %v1175_v14, 0.0 }
 0x43d   :  { %v737_v42 = vpop.xlane.xlu0 %736 }
 0x43e   :  { %1452 = vlog2.f32 %v737_v42  ;;  %v1176_v42 = vsub.f32 %v884_v20, %v3293_v63 }
 0x43f   :  { %1454 = vlog2.f32 %v740_v58 }
 0x440   :  { %v1209_v40 = vsel %vm1207_vm12, %v1176_v42, 0.0  ;;  %v3296_v42 = vld [vmem:[#allocation13_spill] sm:$0xff] }
 0x441   :  { %v743_v47 = vpop.xlane.xlu0 %742  ;;  %v1210_v60 = vadd.f32 %v1209_v40, %v1208_v15  ;;  %v3297_v15 = vld [vmem:[#allocation15_spill] sm:$0xff] }
 0x442   :  { %1456 = vlog2.f32 %v743_v47 }
 0x443   :  { %1458 = vlog2.f32 %v746_v12 }
 0x444   :  { %v1449_v17 = vpop.eup %1448 }
 0x445   :  { %v749_v53 = vpop.xlane.xlu0 %748  ;;  %v824_v59 = vmul.f32 0.6931472, %v1449_v17  ;;  %v1451_v8 = vpop.eup %1450  ;;  %v3295_v17 = vld [vmem:[#allocation12_spill] sm:$0xff] }
 0x446   :  { %v826_v38 = vmul.f32 0.6931472, %v1451_v8  ;;  %1460 = vlog2.f32 %v749_v53 }
 0x447   :  { %v885_v25 = vadd.f32 %v824_v59, %v2704_v44  ;;  %1462 = vlog2.f32 %v752_v24 }
 0x448   :  { %v1453_v37 = vpop.eup %1452  ;;  %v886_v19 = vadd.f32 %v826_v38, %v2682_v50 }
 0x449   :  { %v755_v39 = vpop.xlane.xlu1 %754  ;;  %v2954_v30 = vpop.xlane.xlu0 %1119  ;;  %v1177_v58 = vsub.f32 %v885_v25, %v3295_v17  ;;  %v828_v33 = vmul.f32 0.6931472, %v1453_v37 }
 0x44a   :  { %v1455_v44 = vpop.eup %1454  ;;  %v1178_v12 = vsub.f32 %v886_v19, %v2672_v27  ;;  %1464 = vlog2.f32 %v755_v39 }
 0x44b   :  { %v1211_v59 = vsel %vm1207_vm12, %v1177_v58, 0.0  ;;  %v887_v20 = vadd.f32 %v828_v33, %v2716_v43  ;;  %v830_v37 = vmul.f32 0.6931472, %v1455_v44 }
 0x44c   :  { %v1457_v8 = vpop.eup %1456  ;;  %v1212_v63 = vadd.f32 %v1211_v59, %v1210_v60  ;;  %v1213_v53 = vsel %vm1207_vm12, %v1178_v12, 0.0 }
 0x44d   :  { %v758_v35 = vpop.xlane.xlu1 %757  ;;  %v2957_v55 = vpop.xlane.xlu0 %1122  ;;  %v1179_v17 = vsub.f32 %v887_v20, %v3296_v42  ;;  %v832_v50 = vmul.f32 0.6931472, %v1457_v8  ;;  %v888_v14 = vadd.f32 %v830_v37, %v2690_v13  ;;  %v3298_v8 = vld [vmem:[#allocation16_spill] sm:$0xff]  ;;  %v3299_v37 = vld [vmem:[#allocation18_spill] sm:$0xff] }
 0x44e   :  { %v1459_v58 = vpop.eup %1458  ;;  %v1214_v43 = vadd.f32 %v1213_v53, %v1212_v63  ;;  %1466 = vlog2.f32 %v758_v35 }
 0x44f   :  { %v1215_v33 = vsel %vm1207_vm12, %v1179_v17, 0.0  ;;  %v889_v27 = vadd.f32 %v832_v50, %v2722_v3  ;;  %v1180_v59 = vsub.f32 %v888_v14, %v3297_v15  ;;  %v834_v24 = vmul.f32 0.6931472, %v1459_v58 }
 0x450   :  { %v1461_v40 = vpop.eup %1460  ;;  %v1216_v20 = vadd.f32 %v1215_v33, %v1214_v43 }
 0x451   :  { %v761_v34 = vpop.xlane.xlu1 %760  ;;  %v2964_v49 = vpop.xlane.xlu0 %1125  ;;  %v1181_v60 = vsub.f32 %v889_v27, %v3298_v8  ;;  %v836_v13 = vmul.f32 0.6931472, %v1461_v40  ;;  %v1217_v39 = vsel %vm1207_vm12, %v1180_v59, 0.0  ;;  %v890_v63 = vadd.f32 %v834_v24, %v3299_v37 }
 0x452   :  { %1468 = vlog2.f32 %v761_v34  ;;  %v1463_v3 = vpop.eup %1462  ;;  %v1218_v42 = vadd.f32 %v1217_v39, %v1216_v20 }
 0x453   :  { %v1219_v17 = vsel %vm1207_vm12, %v1181_v60, 0.0  ;;  %v891_v50 = vadd.f32 %v836_v13, %v2728_v11  ;;  %v1182_v14 = vsub.f32 %v890_v63, %v2930_v48 }
 0x454   :  { %v1465_v53 = vpop.eup %1464  ;;  %v1220_v43 = vadd.f32 %v1219_v17, %v1218_v42 }
 0x455   :  { %v764_v18 = vpop.xlane.xlu1 %763  ;;  %v2972_v54 = vpop.xlane.xlu0 %1128  ;;  %v1183_v33 = vsub.f32 %v891_v50, %v2940_v32  ;;  %v840_v27 = vmul.f32 0.6931472, %v1465_v53  ;;  %v1221_v59 = vsel %vm1207_vm12, %v1182_v14, 0.0 }
 0x456   :  { %1470 = vlog2.f32 %v764_v18  ;;  %v838_v18 = vmul.f32 0.6931472, %v1463_v3  ;;  %v1222_v20 = vadd.f32 %v1221_v59, %v1220_v43 }
 0x457   :  { %v1223_v48 = vsel %vm1207_vm12, %v1183_v33, 0.0 }
 0x458   :  { %v1467_v58 = vpop.eup %1466  ;;  %v892_v11 = vadd.f32 %v838_v18, %v2706_v62  ;;  %v1224_v63 = vadd.f32 %v1223_v48, %v1222_v20 }
 0x459   :  { %v767_v41 = vpop.xlane.xlu1 %766  ;;  %v2979_v19 = vpop.xlane.xlu0 %1131 }
 0x45a   :  { %1472 = vlog2.f32 %v767_v41  ;;  %v1184_v60 = vsub.f32 %v892_v11, %v2946_v0 }
 0x45c   :  { %v1469_v41 = vpop.eup %1468  ;;  %v1225_v50 = vsel %vm1207_vm12, %v1184_v60, 0.0 }
 0x45d   :  { %v770_v26 = vpop.xlane.xlu1 %769  ;;  %v2985_v35 = vpop.xlane.xlu0 %1134  ;;  %v844_v8 = vmul.f32 0.6931472, %v1469_v41  ;;  %v1226_v14 = vadd.f32 %v1225_v50, %v1224_v63 }
 0x45e   :  { %1474 = vlog2.f32 %v770_v26  ;;  %v842_v26 = vmul.f32 0.6931472, %v1467_v58 }
 0x45f   :  { %v895_v3 = vadd.f32 %v844_v8, %v2746_v51 }
 0x460   :  { %v1471_v24 = vpop.eup %1470  ;;  %v894_v13 = vadd.f32 %v842_v26, %v2730_v5 }
 0x461   :  { %v773_v47 = vpop.xlane.xlu1 %772  ;;  %v2991_v40 = vpop.xlane.xlu0 %1137  ;;  %v846_v39 = vmul.f32 0.6931472, %v1471_v24 }
 0x462   :  { %1476 = vlog2.f32 %v773_v47  ;;  %v893_v47 = vadd.f32 %v840_v27, %v2738_v4  ;;  %v1186_v0 = vsub.f32 %v894_v13, %v2950_v21 }
 0x463   :  { %v896_v5 = vadd.f32 %v846_v39, %v2748_v7 }
 0x464   :  { %v1473_v32 = vpop.eup %1472  ;;  %v1229_v21 = vsel %vm1207_vm12, %v1186_v0, 0.0 }
 0x465   :  { %v776_v25 = vpop.xlane.xlu1 %775  ;;  %v2999_v62 = vpop.xlane.xlu0 %1140  ;;  %v848_v42 = vmul.f32 0.6931472, %v1473_v32  ;;  %v1188_v7 = vsub.f32 %v896_v5, %v2954_v30 }
 0x466   :  { %1478 = vlog2.f32 %v776_v25 }
 0x467   :  { %v897_v51 = vadd.f32 %v848_v42, %v2758_v16 }
 0x468   :  { %v1475_v37 = vpop.eup %1474 }
 0x469   :  { %v779_v38 = vpop.xlane.xlu1 %778  ;;  %v850_v53 = vmul.f32 0.6931472, %v1475_v37  ;;  %v3009_v43 = vpop.xlane.xlu0 %1143  ;;  %v1189_v16 = vsub.f32 %v897_v51, %v2957_v55 }
 0x46a   :  { %1480 = vlog2.f32 %v779_v38  ;;  %v1185_v38 = vsub.f32 %v893_v47, %v2948_v46  ;;  %v1187_v46 = vsub.f32 %v895_v3, %v2952_v28  ;;  %v1233_v47 = vsel %vm1207_vm12, %v1188_v7, 0.0 }
 0x46b   :  { %v898_v27 = vadd.f32 %v850_v53, %v2762_v57  ;;  %v1235_v60 = vsel %vm1207_vm12, %v1189_v16, 0.0 }
 0x46c   :  { %v1477_v4 = vpop.eup %1476  ;;  %v1231_v28 = vsel %vm1207_vm12, %v1187_v46, 0.0 }
 0x46d   :  { %v782_v44 = vpop.xlane.xlu1 %781  ;;  %v852_v18 = vmul.f32 0.6931472, %v1477_v4  ;;  %v1190_v30 = vsub.f32 %v898_v27, %v2964_v49 }
 0x46e   :  { %1482 = vlog2.f32 %v782_v44 }
 0x46f   :  { %v899_v59 = vadd.f32 %v852_v18, %v2770_v10 }
 0x470   :  { %v1479_v44 = vpop.eup %1478 }
 0x471   :  { %v785_v12 = vpop.xlane.xlu1 %784  ;;  %v1191_v55 = vsub.f32 %v899_v59, %v2972_v54 }
 0x472   :  { %1484 = vlog2.f32 %v785_v12  ;;  %v1227_v12 = vsel %vm1207_vm12, %v1185_v38, 0.0  ;;  %v1237_v38 = vsel %vm1207_vm12, %v1190_v30, 0.0 }
 0x474   :  { %v1481_v58 = vpop.eup %1480 }
 0x475   :  { %v788_v34 = vpop.xlane.xlu1 %787  ;;  %v856_v11 = vmul.f32 0.6931472, %v1481_v58 }
 0x476   :  { %1486 = vlog2.f32 %v788_v34  ;;  %v854_v34 = vmul.f32 0.6931472, %v1479_v44 }
 0x477   :  { %v901_v10 = vadd.f32 %v856_v11, %v2790_v22 }
 0x478   :  { %v1483_v41 = vpop.eup %1482  ;;  %v900_v20 = vadd.f32 %v854_v34, %v2778_v9 }
 0x479   :  { %v791_v15 = vpop.xlane.xlu1 %790  ;;  %v858_v57 = vmul.f32 0.6931472, %v1483_v41  ;;  %v1193_v54 = vsub.f32 %v901_v10, %v2985_v35 }
 0x47a   :  { %1488 = vlog2.f32 %v791_v15  ;;  %v1228_v15 = vadd.f32 %v1227_v12, %v1226_v14  ;;  %v1192_v9 = vsub.f32 %v900_v20, %v2979_v19 }
 0x47b   :  { %v902_v49 = vadd.f32 %v858_v57, %v2798_v36  ;;  %v1243_v51 = vsel %vm1207_vm12, %v1193_v54, 0.0 }
 0x47c   :  { %v1485_v26 = vpop.eup %1484  ;;  %v1230_v24 = vadd.f32 %v1229_v21, %v1228_v15  ;;  %v1241_v19 = vsel %vm1207_vm12, %v1192_v9, 0.0 }
 0x47d   :  { %v794_v25 = vpop.xlane.xlu1 %793  ;;  %v860_v13 = vmul.f32 0.6931472, %v1485_v26  ;;  %v1194_v14 = vsub.f32 %v902_v49, %v2991_v40 }
 0x47e   :  { %1490 = vlog2.f32 %v794_v25  ;;  %v1232_v32 = vadd.f32 %v1231_v28, %v1230_v24  ;;  %v1147_v25 = vpop.xlane.xlu0 %1146 }
 0x47f   :  { %v903_v22 = vadd.f32 %v860_v13, %v2810_v56 }
 0x480   :  { %v1487_v8 = vpop.eup %1486  ;;  %v1234_v37 = vadd.f32 %v1233_v47, %v1232_v32 }
 0x481   :  { %v797_v17 = vpop.xlane.xlu1 %796  ;;  %v862_v3 = vmul.f32 0.6931472, %v1487_v8  ;;  %v1195_v35 = vsub.f32 %v903_v22, %v2999_v62 }
 0x482   :  { %1492 = vlog2.f32 %v797_v17  ;;  %v1236_v4 = vadd.f32 %v1235_v60, %v1234_v37  ;;  %v1239_v17 = vsel %vm1207_vm12, %v1191_v55, 0.0  ;;  %v1150_v5 = vpop.xlane.xlu0 %1149 }
 0x483   :  { %v904_v36 = vadd.f32 %v862_v3, %v2818_v23  ;;  %v1247_v41 = vsel %vm1207_vm12, %v1195_v35, 0.0 }
 0x484   :  { %v1489_v39 = vpop.eup %1488  ;;  %v1238_v0 = vadd.f32 %v1237_v38, %v1236_v4 }
 0x485   :  { %v800_v33 = vpop.xlane.xlu1 %799  ;;  %v864_v44 = vmul.f32 0.6931472, %v1489_v39  ;;  %v1196_v21 = vsub.f32 %v904_v36, %v3009_v43  ;;  %v3300_v36 = vld [vmem:[#allocation19_spill] sm:$0xff] }
 0x486   :  { %v1240_v46 = vadd.f32 %v1239_v17, %v1238_v0  ;;  %v1153_v27 = vpop.xlane.xlu0 %1152 }
 0x487   :  { %v905_v56 = vadd.f32 %v864_v44, %v2830_v61  ;;  %v1249_v59 = vsel %vm1207_vm12, %v1196_v21, 0.0 }
 0x488   :  { %v1491_v42 = vpop.eup %1490  ;;  %v1242_v58 = vadd.f32 %v1241_v19, %v1240_v46 }
 0x489   :  { %v803_v48 = vpop.xlane.xlu1 %802  ;;  %v866_v12 = vmul.f32 0.6931472, %v1491_v42  ;;  %v1197_v15 = vsub.f32 %v905_v56, %v1147_v25 }
 0x48a   :  { %1494 = vlog2.f32 %v803_v48  ;;  %v1244_v7 = vadd.f32 %v1243_v51, %v1242_v58  ;;  %v1159_v57 = vpop.xlane.xlu0 %1158 }
 0x48b   :  { %1496 = vlog2.f32 %v800_v33  ;;  %v1245_v33 = vsel %vm1207_vm12, %v1194_v14, 0.0  ;;  %v906_v40 = vadd.f32 %v866_v12, %v2838_v6  ;;  %v1251_v6 = vsel %vm1207_vm12, %v1197_v15, 0.0 }
 0x48c   :  { %v1493_v50 = vpop.eup %1492  ;;  %v1246_v61 = vadd.f32 %v1245_v33, %v1244_v7  ;;  %v3301_v33 = vld [vmem:[#allocation25_spill] sm:$0xff] }
 0x48d   :  { %v806_v63 = vpop.xlane.xlu1 %805  ;;  %v868_v18 = vmul.f32 0.6931472, %v1493_v50  ;;  %v1198_v11 = vsub.f32 %v906_v40, %v1150_v5 }
 0x48e   :  { %v1248_v43 = vadd.f32 %v1247_v41, %v1246_v61  ;;  %v1165_v3 = vpop.xlane.xlu0 %1164 }
 0x48f   :  { %v907_v62 = vadd.f32 %v868_v18, %v2850_v29  ;;  %v1253_v25 = vsel %vm1207_vm12, %v1198_v11, 0.0 }
 0x490   :  { %v1250_v30 = vadd.f32 %v1249_v59, %v1248_v43 }
 0x491   :  { %v809_v53 = vpop.xlane.xlu1 %808  ;;  %v1199_v20 = vsub.f32 %v907_v62, %v1153_v27 }
 0x492   :  { %1498 = vlog2.f32 %v809_v53  ;;  %v1252_v60 = vadd.f32 %v1251_v6, %v1250_v30  ;;  %v1171_v46 = vpop.xlane.xlu0 %1170 }
 0x493   :  { %1500 = vlog2.f32 %v806_v63  ;;  %v1255_v13 = vsel %vm1207_vm12, %v1199_v20, 0.0 }
 0x494   :  { %v1495_v23 = vpop.eup %1494  ;;  %v1254_v37 = vadd.f32 %v1253_v25, %v1252_v60 }
 0x495   :  { %v812_v34 = vpop.xlane.xlu1 %811  ;;  %v1497_v28 = vpop.eup %1496  ;;  %v872_v26 = vmul.f32 0.6931472, %v1495_v23 }
 0x496   :  { %1502 = vlog2.f32 %v812_v34  ;;  %v870_v48 = vmul.f32 0.6931472, %v1497_v28  ;;  %v1256_v42 = vadd.f32 %v1255_v13, %v1254_v37 }
 0x497   :  { %v909_v29 = vadd.f32 %v872_v26, %v2870_v1 }
 0x498   :  { %v908_v10 = vadd.f32 %v870_v48, %v2858_v52 }
 0x499   :  { %v815_v16 = vpop.xlane.xlu1 %814  ;;  %v1201_v63 = vsub.f32 %v909_v29, %v1159_v57 }
 0x49a   :  { %1504 = vlog2.f32 %v815_v16 }
 0x49b   :  { %v1259_v0 = vsel %vm1207_vm12, %v1201_v63, 0.0 }
 0x49c   :  { %v1499_v24 = vpop.eup %1498 }
 0x49d   :  { %v1501_v47 = vpop.eup %1500  ;;  %v818_v8 = vpop.xlane.xlu1 %817  ;;  %v876_v32 = vmul.f32 0.6931472, %v1499_v24 }
 0x49e   :  { %1506 = vlog2.f32 %v818_v8  ;;  %v874_v55 = vmul.f32 0.6931472, %v1501_v47 }
 0x49f   :  { %v911_v38 = vadd.f32 %v876_v32, %v2890_v45 }
 0x4a0   :  { %v1503_v39 = vpop.eup %1502  ;;  %v910_v54 = vadd.f32 %v874_v55, %v2878_v2 }
 0x4a1   :  { %v1156_v9 = vpop.xlane.xlu1 %1155  ;;  %v878_v4 = vmul.f32 0.6931472, %v1503_v39  ;;  %v1203_v50 = vsub.f32 %v911_v38, %v1165_v3 }
 0x4a2   :  { %v1200_v49 = vsub.f32 %v908_v10, %v1156_v9 }
 0x4a3   :  { %v912_v12 = vadd.f32 %v878_v4, %v3300_v36  ;;  %v1263_v18 = vsel %vm1207_vm12, %v1203_v50, 0.0 }
 0x4a4   :  { %v1505_v1 = vpop.eup %1504  ;;  %v1257_v17 = vsel %vm1207_vm12, %v1200_v49, 0.0 }
 0x4a5   :  { %v880_v22 = vmul.f32 0.6931472, %v1505_v1  ;;  %v1258_v44 = vadd.f32 %v1257_v17, %v1256_v42  ;;  %v1162_v52 = vpop.xlane.xlu1 %1161 }
 0x4a6   :  { %v1202_v19 = vsub.f32 %v910_v54, %v1162_v52 }
 0x4a7   :  { %v913_v5 = vadd.f32 %v880_v22, %v2910_v31  ;;  %v1260_v53 = vadd.f32 %v1259_v0, %v1258_v44 }
 0x4a8   :  { %v1507_v45 = vpop.eup %1506  ;;  %v1261_v14 = vsel %vm1207_vm12, %v1202_v19, 0.0 }
 0x4a9   :  { %v882_v51 = vmul.f32 0.6931472, %v1507_v45  ;;  %v1262_v35 = vadd.f32 %v1261_v14, %v1260_v53  ;;  %v1168_v56 = vpop.xlane.xlu1 %1167  ;;  %v1205_v2 = vsub.f32 %v913_v5, %v1171_v46 }
 0x4aa   :  { %v1204_v58 = vsub.f32 %v912_v12, %v1168_v56 }
 0x4ab   :  { %v1264_v34 = vadd.f32 %v1263_v18, %v1262_v35  ;;  %v914_v21 = vadd.f32 %v882_v51, %v3301_v33  ;;  %v1267_v7 = vsel %vm1207_vm12, %v1205_v2, 0.0 }
 0x4ac   :  { %v1265_v40 = vsel %vm1207_vm12, %v1204_v58, 0.0 }
 0x4ad   :  { %v1266_v31 = vadd.f32 %v1265_v40, %v1264_v34  ;;  %v1174_v23 = vpop.xlane.xlu1 %1173 }
 0x4ae   :  { %v1206_v27 = vsub.f32 %v914_v21, %v1174_v23 }
 0x4af   :  { %v1268_v41 = vadd.f32 %v1267_v7, %v1266_v31 }
 0x4b0   :  { %v1269_v15 = vsel %vm1207_vm12, %v1206_v27, 0.0 }
 0x4b1   :  { %v1270_v62 = vadd.f32 %v1269_v15, %v1268_v41 }
 0x4b3   :  { %1271 = vadd.xlane.f32.xlu0 %v1270_v62 }
 0x540   :  { %v1272_v28 = vpop.xlane.xlu0 %1271 }
 0x541   :  { %v1273_v61 = vrot.slane %v1272_v28, 4 }
 0x543   :  { %v1274_v16 = vadd.f32 %v1273_v61, %v1272_v28 }
 0x545   :  { %v1275_v59 = vrot.slane %v1274_v16, 2 }
 0x547   :  { %v1276_v11 = vadd.f32 %v1275_v59, %v1274_v16 }
 0x549   :  { %v1277_v26 = vrot.slane %v1276_v11, 1 }
 0x54b   :  { %v1278_v43 = vadd.f32 %v1277_v26, %v1276_v11 }
 0x54d   :  { %1307 = vpush %v1278_v43 }
 0x57e   :  { %s1308_s28 = spop %1307 }
 0x57f   :  { %s1282_s29 = smul.f32 0.00390625, %s1308_s28 }
 0x581   :  { %v1283_v24 = vstv %s1282_s29 }
 0x582   :  { %1285 = vst.msk [vmem:[#allocation5] sm:$0x1] %vm1284_vm13, %v1283_v24 }
 0x583   :  { %1541 = shalt.err (!%p1538_p12)
}
 0x584   :  { %s1542_s5 = scalar_lea.hbm %s3071_s1, 16 }
 0x585   :  { %p1543_p13 = scmp.ne.s32.totalorder %s3071_s1, %s1542_s5  ;;  %p1546_p0 = scmp.lt.u32.totalorder %s1542_s5, %s3071_s1 }
 0x587   :  { %p1548_p1 = pnand %p1546_p0, %p1543_p13 }
 0x589   :  { %1551 = shalt.err (!%p1548_p1)
}
 0x58a   :  { %1295 = dma.vmem_to_hbm [thread:$0]  %s1293_s27, 16, %s3071_s1, [#allocation4]  }
 0x58b   :  { %1554 = dma.done.wait [#allocation4], 16  }
 0x58c   :  { %1555 = vsyncadd [#allocation4], 4294967280 }
 0x58d   :  { %1299 = vsyncpa [#allocation3], 1 }
 0x58e   :  { %1300 = vsyncpa [#allocation4], 1 }

</bundles_post_ra>
